<compile_context>
chip_gen: v7x
topology: tpu7x:2x2x1
jax: 0.10.0
libtpu: 0.0.40
codegen_flags: <defaults>
</compile_context>

<pallas_src>
import numpy as np
import jax
import jax.numpy as jnp
from jax.experimental import pallas as pl
from jax.experimental.pallas import tpu as pltpu

# ---------------------------- static configuration ----------------------------
B = 2             # batch
N = 8             # nodes
K = 4             # neighbors per node
E = N * K         # edges (k-major: row k*N + n)
D0 = 16           # fiber = (D0,)
HEADS = 2
DIM_HEAD = 8
HIDDEN = HEADS * DIM_HEAD          # value hidden dim (single_headed_kv=False)
ATTN_MULT = 4
ATTN_HID = HEADS * ATTN_MULT       # attn hidden dim
LO = ATTN_HID + HIDDEN             # DTP fiber_out[0]
LI = D0
RH = 16                            # radial_hidden_dim
K1 = K + 1                         # neighbors + self (attend_self=True)
NODE_W = 2 * D0 + LO               # fused node projection width
SCALE = DIM_HEAD ** -0.5
LEAKY_SLOPE = 0.1
NORM_EPS = 1e-12
LN_EPS = 1e-5


def _silu(x):
    return x * jax.nn.sigmoid(x)


def _layernorm(h):
    # F.layer_norm over last dim, gamma=1, beta=0 -- single sum / sum-of-squares pass
    inv_n = 1.0 / h.shape[-1]
    s = jnp.sum(h, axis=-1, keepdims=True)
    s2 = jnp.sum(h * h, axis=-1, keepdims=True)
    mu = s * inv_n
    var = jnp.maximum(s2 * inv_n - mu * mu, 0.0)
    return (h - mu) * jax.lax.rsqrt(var + LN_EPS)


# -------------------------------- fused kernel --------------------------------
def _fused_kernel(feat_ref, idx_ref, rel_ref, mask_ref,
                  gamma_ref, wnode_ref,
                  w1_ref, b1_ref, w2_ref, b2_ref, w3_ref, b3_ref,
                  wdtp_ref, rep_ref, sel_ref, hexp_ref,
                  wlog_ref, wval_ref, wout_ref,
                  out_ref):
    # ---- node stage: prenorm (RMS over channels) + fused DTP projections ----
    x = feat_ref[0]                                               # (N, D0)
    rms = jnp.sqrt(jnp.sum(x * x, axis=-1, keepdims=True)) * (D0 ** -0.5)
    xn = x / jnp.maximum(rms, NORM_EPS) * gamma_ref[...]
    proj = jnp.dot(xn, wnode_ref[...], preferred_element_type=jnp.float32)  # (N, NODE_W)
    xi = proj[:, :D0]
    xj = proj[:, D0:2 * D0]
    self_out = proj[:, 2 * D0:]                                   # (N, LO)

    # ---- neighbor gather: one-hot matmul on VMEM-resident xj (k-major rows) ----
    idxc = idx_ref[0]                                             # (E, 1) int32
    iota2 = jax.lax.broadcasted_iota(jnp.int32, (E, N), 1)
    onehot = (idxc == iota2).astype(jnp.float32)                  # (E, N)
    xj_g = jnp.dot(onehot, xj, preferred_element_type=jnp.float32)   # (E, D0)
    xi_rep = jnp.concatenate([xi] * K, axis=0)                    # (E, D0)
    xe = xj_g + xi_rep

    # ---- Radial MLP on rel_dist (exact `rp` Sequential of the spec module) ----
    r = rel_ref[0]                                                # (E, 1)
    h = _silu(r * w1_ref[...] + b1_ref[...])                      # Linear(1, RH) + SiLU
    h = _layernorm(h)
    h = _silu(jnp.dot(h, w2_ref[...], preferred_element_type=jnp.float32) + b2_ref[...])
    h = _layernorm(h)
    rflat = jnp.dot(h, w3_ref[...], preferred_element_type=jnp.float32) + b3_ref[...]  # (E, LO*LI)

    # ---- tensor-product contraction, kept 2D / lane-aligned (no (E,LO,LI) reshape)
    # chunk[e, lo] = sum_li rflat[e, lo*LI+li] * xe[e, li]
    x_rep = jnp.dot(xe, rep_ref[...], preferred_element_type=jnp.float32)              # (E, LO*LI)
    chunk = jnp.dot(rflat * x_rep, sel_ref[...], preferred_element_type=jnp.float32)   # (E, LO)
    edge_out = jnp.dot(chunk, wdtp_ref[...], preferred_element_type=jnp.float32)       # (E, LO) DTP.to_out

    # ---- attention ----
    def leaky(a):
        return jnp.where(a >= 0, a, LEAKY_SLOPE * a)

    log_e = jnp.dot(leaky(edge_out[:, :ATTN_HID]), wlog_ref[...],
                    preferred_element_type=jnp.float32) * SCALE    # (E, HEADS)
    log_s = jnp.dot(leaky(self_out[:, :ATTN_HID]), wlog_ref[...],
                    preferred_element_type=jnp.float32) * SCALE    # (N, HEADS)
    # neighbor mask (1 = keep) applied to edge logits (self is never masked)
    log_e = log_e - (1.0 - mask_ref[0]) * 1e30

    v_e = jnp.dot(_silu(edge_out[:, ATTN_HID:]), wval_ref[...],
                  preferred_element_type=jnp.float32)              # (E, HIDDEN)
    v_s = jnp.dot(_silu(self_out[:, ATTN_HID:]), wval_ref[...],
                  preferred_element_type=jnp.float32)              # (N, HIDDEN)

    # softmax over {self, k=0..K-1}: unrolled, purely (N, HEADS) elementwise math
    logs = [log_s] + [log_e[k * N:(k + 1) * N] for k in range(K)]
    m = logs[0]
    for lg in logs[1:]:
        m = jnp.maximum(m, lg)
    exps = [jnp.exp(lg - m) for lg in logs]
    den = exps[0]
    for ex in exps[1:]:
        den = den + ex
    inv = 1.0 / den                                                # (N, HEADS)

    # weighted aggregation: expand heads with one constant matmul, slice-add groups
    attn_all = jnp.concatenate(exps, axis=0)                       # (K1*N, HEADS)
    v_all = jnp.concatenate([v_s, v_e], axis=0)                    # (K1*N, HIDDEN)
    w_all = jnp.dot(attn_all, hexp_ref[...],
                    preferred_element_type=jnp.float32) * v_all    # (K1*N, HIDDEN)
    agg = w_all[:N]
    for j in range(1, K1):
        agg = agg + w_all[j * N:(j + 1) * N]
    agg = agg * jnp.dot(inv, hexp_ref[...], preferred_element_type=jnp.float32)  # normalize

    out = jnp.dot(agg, wout_ref[...], preferred_element_type=jnp.float32)        # (N, D0)
    # lane-dense output row: (N, D0) -> (1, N*D0) = (1, 128)
    out_ref[0] = jnp.concatenate([out[i:i + 1, :] for i in range(N)], axis=1)


# ------------------------------ pallas_call glue ------------------------------
def _wspec(shape):
    return pl.BlockSpec(shape, lambda b: (0,) * len(shape))


def _bspec(shape):
    return pl.BlockSpec((1,) + shape, lambda b: (b,) + (0,) * len(shape))


def fused_forward(feat, idx_km, rel_km, mask_km, p):
    return pl.pallas_call(
        _fused_kernel,
        grid=(B,),
        in_specs=[
            _bspec((N, D0)),            # feat
            _bspec((E, 1)),             # neighbor indices (k-major, one per row)
            _bspec((E, 1)),             # rel_dist (k-major)
            _bspec((E, 1)),             # neighbor mask (k-major, f32 0/1)
            _wspec((1, D0)),            # gamma (Norm scale)
            _wspec((D0, NODE_W)),       # fused [w_xi | w_xj | w_self]
            _wspec((1, RH)), _wspec((1, RH)),              # Radial w1, b1
            _wspec((RH, RH)), _wspec((1, RH)),             # Radial w2, b2
            _wspec((RH, LO * LI)), _wspec((1, LO * LI)),   # Radial w3, b3
            _wspec((LO, LO)),           # DTP.to_out
            _wspec((LI, LO * LI)),      # constant replicate matrix
            _wspec((LO * LI, LO)),      # constant select (block-ones) matrix
            _wspec((HEADS, HIDDEN)),    # constant head-expand matrix
            _wspec((ATTN_HID, HEADS)),  # to_attn_logits (no bias)
            _wspec((HIDDEN, HIDDEN)),   # to_values Linear
            _wspec((HIDDEN, D0)),       # MLPAttention.to_out
        ],
        out_specs=pl.BlockSpec((1, 1, N * D0), lambda b: (b, 0, 0)),
        out_shape=jax.ShapeDtypeStruct((B, 1, N * D0), jnp.float32),
        compiler_params=pltpu.CompilerParams(dimension_semantics=("parallel",)),
    )(feat, idx_km, rel_km, mask_km,
      p['gamma'], p['w_node'], p['w1'], p['b1'], p['w2'], p['b2'],
      p['w3'], p['b3'], p['w_dtp_out'], p['rep_mat'], p['sel_mat'],
      p['head_expand'], p['w_logits'], p['w_val'], p['w_out'])


@jax.jit
def mlp_attention_forward(features0, nbr_idx, rel_dist, nbr_mask, p):
    """features0: (B,N,D0,1); nbr_idx: (B,N,K) int32; rel_dist: (B,N,K,1); nbr_mask: (B,N,K)."""
    feat = features0[..., 0]                                               # (B, N, D0)
    # k-major edge layout: row k*N + n -> per-neighbor blocks are aligned 8-row slices
    idx_km = jnp.transpose(nbr_idx, (0, 2, 1)).astype(jnp.int32).reshape(B, E, 1)
    rel_km = jnp.transpose(rel_dist[..., 0], (0, 2, 1)).reshape(B, E, 1)
    mask_km = jnp.transpose(nbr_mask.astype(jnp.float32), (0, 2, 1)).reshape(B, E, 1)
    out2d = fused_forward(feat, idx_km, rel_km, mask_km, p)                # (B, 1, N*D0)
    return out2d.reshape(B, N, D0)[..., None]                              # (B, N, D0, 1)


# -------------------------------- parameters ----------------------------------
def init_params(key):
    ks = jax.random.split(key, 13)
    rnd = lambda k, shape, scale=1.0: jax.random.normal(k, shape, jnp.float32) * scale
    w_xi = rnd(ks[0], (D0, D0), D0 ** -0.5)                      # DTP.to_xi
    w_xj = rnd(ks[1], (D0, D0), D0 ** -0.5)                      # DTP.to_xj
    w_self = rnd(ks[2], (D0, LO), D0 ** -0.5)                    # DTP.self_interact

    # static matrices for the lane-aligned 2D tensor-product contraction
    col = np.arange(LO * LI)
    rep_mat = (col[None, :] % LI == np.arange(LI)[:, None]).astype(np.float32)    # (LI, LO*LI)
    sel_mat = (col[:, None] // LI == np.arange(LO)[None, :]).astype(np.float32)   # (LO*LI, LO)
    head_expand = (np.arange(HIDDEN)[None, :] // DIM_HEAD
                   == np.arange(HEADS)[:, None]).astype(np.float32)               # (HEADS, HIDDEN)

    return dict(
        gamma=jnp.ones((1, D0), jnp.float32),                    # Norm scale (init = 1)
        w_node=jnp.concatenate([w_xi, w_xj, w_self], axis=1),    # fused (D0, 2*D0+LO)
        w1=rnd(ks[3], (1, RH)),                                  # Radial Linear(1, RH)
        b1=rnd(ks[4], (1, RH), 0.1),
        w2=rnd(ks[5], (RH, RH), RH ** -0.5),                     # Radial Linear(RH, RH)
        b2=rnd(ks[6], (1, RH), 0.1),
        w3=rnd(ks[7], (RH, LO * LI), RH ** -0.5),                # Radial Linear(RH, LO*LI)
        b3=rnd(ks[8], (1, LO * LI), 0.1),
        w_dtp_out=rnd(ks[9], (LO, LO), LO ** -0.5),              # DTP.to_out
        rep_mat=jnp.asarray(rep_mat),
        sel_mat=jnp.asarray(sel_mat),
        head_expand=jnp.asarray(head_expand),
        w_logits=rnd(ks[10], (ATTN_HID, HEADS), ATTN_HID ** -0.5),
        w_val=rnd(ks[11], (HIDDEN, HIDDEN), HIDDEN ** -0.5),
        w_out=rnd(ks[12], (HIDDEN, D0), HIDDEN ** -0.5),
    )


# ----------------------------------- main --------------------------------------
if __name__ == "__main__":
    key = jax.random.PRNGKey(0)
    kp, kf, ki, kr = jax.random.split(key, 4)

    params = init_params(kp)

    features = jax.random.normal(kf, (B, N, D0, 1), jnp.float32)       # degree-0 features
    neighbor_indices = jax.random.randint(ki, (B, N, K), 0, N, jnp.int32)
    neighbor_mask = jnp.ones((B, N, K), jnp.bool_)
    rel_dist = jnp.abs(jax.random.normal(kr, (B, N, K, 1), jnp.float32)) + 0.5

    out = mlp_attention_forward(features, neighbor_indices, rel_dist, neighbor_mask, params)
    out = jax.block_until_ready(out)

    assert out.shape == (B, N, D0, 1), out.shape
    assert bool(jnp.all(jnp.isfinite(out)))
    print("KERNEL_OK")
</pallas_src>

<mosaic_0001>
module attributes {stable_mosaic.version = 11 : i64} {
  func.func @_fused_kernel(%arg0: i32, %arg1: memref<1x8x16xf32, #tpu.memory_space<vmem>>, %arg2: memref<1x32x1xi32, #tpu.memory_space<vmem>>, %arg3: memref<1x32x1xf32, #tpu.memory_space<vmem>>, %arg4: memref<1x32x1xf32, #tpu.memory_space<vmem>>, %arg5: memref<1x16xf32, #tpu.memory_space<vmem>>, %arg6: memref<16x56xf32, #tpu.memory_space<vmem>>, %arg7: memref<1x16xf32, #tpu.memory_space<vmem>>, %arg8: memref<1x16xf32, #tpu.memory_space<vmem>>, %arg9: memref<16x16xf32, #tpu.memory_space<vmem>>, %arg10: memref<1x16xf32, #tpu.memory_space<vmem>>, %arg11: memref<16x384xf32, #tpu.memory_space<vmem>>, %arg12: memref<1x384xf32, #tpu.memory_space<vmem>>, %arg13: memref<24x24xf32, #tpu.memory_space<vmem>>, %arg14: memref<16x384xf32, #tpu.memory_space<vmem>>, %arg15: memref<384x24xf32, #tpu.memory_space<vmem>>, %arg16: memref<2x16xf32, #tpu.memory_space<vmem>>, %arg17: memref<8x2xf32, #tpu.memory_space<vmem>>, %arg18: memref<16x16xf32, #tpu.memory_space<vmem>>, %arg19: memref<16x16xf32, #tpu.memory_space<vmem>>, %arg20: memref<1x1x128xf32, #tpu.memory_space<vmem>>) attributes {dimension_semantics = [#tpu.dimension_semantics<parallel>], iteration_bounds = array<i64: 2>, scalar_prefetch = 0 : i64, scratch_operands = 0 : i64, tpu.core_type = #tpu.core_type<tc>, window_params = [{transform_indices = @transform_0, window_bounds = array<i64: 1, 8, 16>}, {transform_indices = @transform_1, window_bounds = array<i64: 1, 32, 1>}, {transform_indices = @transform_2, window_bounds = array<i64: 1, 32, 1>}, {transform_indices = @transform_3, window_bounds = array<i64: 1, 32, 1>}, {pipeline_mode = #tpu.pipeline_mode<synchronous>, transform_indices = @transform_4, window_bounds = array<i64: 1, 16>}, {pipeline_mode = #tpu.pipeline_mode<synchronous>, transform_indices = @transform_5, window_bounds = array<i64: 16, 56>}, {pipeline_mode = #tpu.pipeline_mode<synchronous>, transform_indices = @transform_6, window_bounds = array<i64: 1, 16>}, {pipeline_mode = #tpu.pipeline_mode<synchronous>, transform_indices = @transform_7, window_bounds = array<i64: 1, 16>}, {pipeline_mode = #tpu.pipeline_mode<synchronous>, transform_indices = @transform_8, window_bounds = array<i64: 16, 16>}, {pipeline_mode = #tpu.pipeline_mode<synchronous>, transform_indices = @transform_9, window_bounds = array<i64: 1, 16>}, {pipeline_mode = #tpu.pipeline_mode<synchronous>, transform_indices = @transform_10, window_bounds = array<i64: 16, 384>}, {pipeline_mode = #tpu.pipeline_mode<synchronous>, transform_indices = @transform_11, window_bounds = array<i64: 1, 384>}, {pipeline_mode = #tpu.pipeline_mode<synchronous>, transform_indices = @transform_12, window_bounds = array<i64: 24, 24>}, {pipeline_mode = #tpu.pipeline_mode<synchronous>, transform_indices = @transform_13, window_bounds = array<i64: 16, 384>}, {pipeline_mode = #tpu.pipeline_mode<synchronous>, transform_indices = @transform_14, window_bounds = array<i64: 384, 24>}, {pipeline_mode = #tpu.pipeline_mode<synchronous>, transform_indices = @transform_15, window_bounds = array<i64: 2, 16>}, {pipeline_mode = #tpu.pipeline_mode<synchronous>, transform_indices = @transform_16, window_bounds = array<i64: 8, 2>}, {pipeline_mode = #tpu.pipeline_mode<synchronous>, transform_indices = @transform_17, window_bounds = array<i64: 16, 16>}, {pipeline_mode = #tpu.pipeline_mode<synchronous>, transform_indices = @transform_18, window_bounds = array<i64: 16, 16>}, {transform_indices = @transform_19, window_bounds = array<i64: 1, 1, 128>}]} {
    %c0 = arith.constant 0 : index
    %c0_0 = arith.constant 0 : index
    %c0_1 = arith.constant 0 : index
    %0 = vector.load %arg1[%c0, %c0_0, %c0_1] : memref<1x8x16xf32, #tpu.memory_space<vmem>>, vector<1x8x16xf32>
    %1 = vector.shape_cast %0 : vector<1x8x16xf32> to vector<8x16xf32>
    %2 = arith.mulf %1, %1 : vector<8x16xf32>
    %cst = arith.constant dense<0.000000e+00> : vector<8xf32>
    %3 = vector.multi_reduction <add>, %2, %cst [1] : vector<8x16xf32> to vector<8xf32>
    %4 = vector.shape_cast %3 : vector<8xf32> to vector<8x1xf32>
    %5 = math.sqrt %4 : vector<8x1xf32>
    %cst_2 = arith.constant 2.500000e-01 : f32
    %6 = vector.broadcast %cst_2 : f32 to vector<8x1xf32>
    %7 = arith.mulf %5, %6 : vector<8x1xf32>
    %cst_3 = arith.constant 9.99999996E-13 : f32
    %8 = vector.broadcast %cst_3 : f32 to vector<8x1xf32>
    %9 = arith.maximumf %7, %8 : vector<8x1xf32>
    %10 = vector.broadcast %9 : vector<8x1xf32> to vector<8x16xf32>
    %11 = arith.divf %1, %10 : vector<8x16xf32>
    %c0_4 = arith.constant 0 : index
    %c0_5 = arith.constant 0 : index
    %12 = vector.load %arg5[%c0_4, %c0_5] : memref<1x16xf32, #tpu.memory_space<vmem>>, vector<1x16xf32>
    %13 = vector.broadcast %12 : vector<1x16xf32> to vector<8x16xf32>
    %14 = arith.mulf %11, %13 : vector<8x16xf32>
    %c0_6 = arith.constant 0 : index
    %c0_7 = arith.constant 0 : index
    %15 = vector.load %arg6[%c0_6, %c0_7] : memref<16x56xf32, #tpu.memory_space<vmem>>, vector<16x56xf32>
    %cst_8 = arith.constant dense<0.000000e+00> : vector<8x56xf32>
    %16 = tpu.matmul %14, %15, %cst_8 {dimension_numbers = #tpu.dot_dimension_numbers<[1], [0], [0], [1], [0, 0, 1, 1], [], []>} : vector<8x16xf32>, vector<16x56xf32>, vector<8x56xf32> -> vector<8x56xf32>
    %17 = vector.extract_strided_slice %16 {offsets = [0, 0], sizes = [8, 16], strides = [1, 1]} : vector<8x56xf32> to vector<8x16xf32>
    %18 = vector.extract_strided_slice %16 {offsets = [0, 16], sizes = [8, 16], strides = [1, 1]} : vector<8x56xf32> to vector<8x16xf32>
    %19 = vector.extract_strided_slice %16 {offsets = [0, 32], sizes = [8, 24], strides = [1, 1]} : vector<8x56xf32> to vector<8x24xf32>
    %c0_9 = arith.constant 0 : index
    %c0_10 = arith.constant 0 : index
    %c0_11 = arith.constant 0 : index
    %20 = vector.load %arg2[%c0_9, %c0_10, %c0_11] : memref<1x32x1xi32, #tpu.memory_space<vmem>>, vector<1x32x1xi32>
    %21 = vector.shape_cast %20 : vector<1x32x1xi32> to vector<32x1xi32>
    %22 = tpu.iota {dimensions = array<i32: 1>} : vector<32x8xi32>
    %23 = vector.broadcast %21 : vector<32x1xi32> to vector<32x8xi32>
    %24 = arith.cmpi eq, %23, %22 : vector<32x8xi32>
    %25 = arith.extui %24 : vector<32x8xi1> to vector<32x8xi32>
    %26 = arith.sitofp %25 : vector<32x8xi32> to vector<32x8xf32>
    %cst_12 = arith.constant dense<0.000000e+00> : vector<32x16xf32>
    %27 = tpu.matmul %26, %18, %cst_12 {dimension_numbers = #tpu.dot_dimension_numbers<[1], [0], [0], [1], [0, 0, 1, 1], [], []>} : vector<32x8xf32>, vector<8x16xf32>, vector<32x16xf32> -> vector<32x16xf32>
    %28 = tpu.concatenate %17, %17, %17, %17 in 0 : vector<8x16xf32>, vector<8x16xf32>, vector<8x16xf32>, vector<8x16xf32> -> vector<32x16xf32>
    %29 = arith.addf %27, %28 : vector<32x16xf32>
    %c0_13 = arith.constant 0 : index
    %c0_14 = arith.constant 0 : index
    %c0_15 = arith.constant 0 : index
    %30 = vector.load %arg3[%c0_13, %c0_14, %c0_15] : memref<1x32x1xf32, #tpu.memory_space<vmem>>, vector<1x32x1xf32>
    %31 = vector.shape_cast %30 : vector<1x32x1xf32> to vector<32x1xf32>
    %c0_16 = arith.constant 0 : index
    %c0_17 = arith.constant 0 : index
    %32 = vector.load %arg7[%c0_16, %c0_17] : memref<1x16xf32, #tpu.memory_space<vmem>>, vector<1x16xf32>
    %33 = vector.broadcast %31 : vector<32x1xf32> to vector<32x16xf32>
    %34 = vector.broadcast %32 : vector<1x16xf32> to vector<32x16xf32>
    %35 = arith.mulf %33, %34 : vector<32x16xf32>
    %c0_18 = arith.constant 0 : index
    %c0_19 = arith.constant 0 : index
    %36 = vector.load %arg8[%c0_18, %c0_19] : memref<1x16xf32, #tpu.memory_space<vmem>>, vector<1x16xf32>
    %37 = vector.broadcast %36 : vector<1x16xf32> to vector<32x16xf32>
    %38 = arith.addf %35, %37 : vector<32x16xf32>
    %39 = arith.negf %38 : vector<32x16xf32>
    %40 = math.exp %39 : vector<32x16xf32>
    %cst_20 = arith.constant 1.000000e+00 : f32
    %41 = vector.broadcast %cst_20 : f32 to vector<32x16xf32>
    %42 = arith.addf %41, %40 : vector<32x16xf32>
    %43 = arith.divf %41, %42 : vector<32x16xf32>
    %44 = arith.mulf %38, %43 : vector<32x16xf32>
    %cst_21 = arith.constant dense<0.000000e+00> : vector<32xf32>
    %45 = vector.multi_reduction <add>, %44, %cst_21 [1] : vector<32x16xf32> to vector<32xf32>
    %46 = vector.shape_cast %45 : vector<32xf32> to vector<32x1xf32>
    %47 = arith.mulf %44, %44 : vector<32x16xf32>
    %cst_22 = arith.constant dense<0.000000e+00> : vector<32xf32>
    %48 = vector.multi_reduction <add>, %47, %cst_22 [1] : vector<32x16xf32> to vector<32xf32>
    %49 = vector.shape_cast %48 : vector<32xf32> to vector<32x1xf32>
    %cst_23 = arith.constant 6.250000e-02 : f32
    %50 = vector.broadcast %cst_23 : f32 to vector<32x1xf32>
    %51 = arith.mulf %46, %50 : vector<32x1xf32>
    %cst_24 = arith.constant 6.250000e-02 : f32
    %52 = vector.broadcast %cst_24 : f32 to vector<32x1xf32>
    %53 = arith.mulf %49, %52 : vector<32x1xf32>
    %54 = arith.mulf %51, %51 : vector<32x1xf32>
    %55 = arith.subf %53, %54 : vector<32x1xf32>
    %cst_25 = arith.constant 0.000000e+00 : f32
    %56 = vector.broadcast %cst_25 : f32 to vector<32x1xf32>
    %57 = arith.maximumf %55, %56 : vector<32x1xf32>
    %58 = vector.broadcast %51 : vector<32x1xf32> to vector<32x16xf32>
    %59 = arith.subf %44, %58 : vector<32x16xf32>
    %cst_26 = arith.constant 9.99999974E-6 : f32
    %60 = vector.broadcast %cst_26 : f32 to vector<32x1xf32>
    %61 = arith.addf %57, %60 : vector<32x1xf32>
    %62 = math.rsqrt %61 : vector<32x1xf32>
    %63 = vector.broadcast %62 : vector<32x1xf32> to vector<32x16xf32>
    %64 = arith.mulf %59, %63 : vector<32x16xf32>
    %c0_27 = arith.constant 0 : index
    %c0_28 = arith.constant 0 : index
    %65 = vector.load %arg9[%c0_27, %c0_28] : memref<16x16xf32, #tpu.memory_space<vmem>>, vector<16x16xf32>
    %cst_29 = arith.constant dense<0.000000e+00> : vector<32x16xf32>
    %66 = tpu.matmul %64, %65, %cst_29 {dimension_numbers = #tpu.dot_dimension_numbers<[1], [0], [0], [1], [0, 0, 1, 1], [], []>} : vector<32x16xf32>, vector<16x16xf32>, vector<32x16xf32> -> vector<32x16xf32>
    %c0_30 = arith.constant 0 : index
    %c0_31 = arith.constant 0 : index
    %67 = vector.load %arg10[%c0_30, %c0_31] : memref<1x16xf32, #tpu.memory_space<vmem>>, vector<1x16xf32>
    %68 = vector.broadcast %67 : vector<1x16xf32> to vector<32x16xf32>
    %69 = arith.addf %66, %68 : vector<32x16xf32>
    %70 = arith.negf %69 : vector<32x16xf32>
    %71 = math.exp %70 : vector<32x16xf32>
    %cst_32 = arith.constant 1.000000e+00 : f32
    %72 = vector.broadcast %cst_32 : f32 to vector<32x16xf32>
    %73 = arith.addf %72, %71 : vector<32x16xf32>
    %74 = arith.divf %72, %73 : vector<32x16xf32>
    %75 = arith.mulf %69, %74 : vector<32x16xf32>
    %cst_33 = arith.constant dense<0.000000e+00> : vector<32xf32>
    %76 = vector.multi_reduction <add>, %75, %cst_33 [1] : vector<32x16xf32> to vector<32xf32>
    %77 = vector.shape_cast %76 : vector<32xf32> to vector<32x1xf32>
    %78 = arith.mulf %75, %75 : vector<32x16xf32>
    %cst_34 = arith.constant dense<0.000000e+00> : vector<32xf32>
    %79 = vector.multi_reduction <add>, %78, %cst_34 [1] : vector<32x16xf32> to vector<32xf32>
    %80 = vector.shape_cast %79 : vector<32xf32> to vector<32x1xf32>
    %cst_35 = arith.constant 6.250000e-02 : f32
    %81 = vector.broadcast %cst_35 : f32 to vector<32x1xf32>
    %82 = arith.mulf %77, %81 : vector<32x1xf32>
    %cst_36 = arith.constant 6.250000e-02 : f32
    %83 = vector.broadcast %cst_36 : f32 to vector<32x1xf32>
    %84 = arith.mulf %80, %83 : vector<32x1xf32>
    %85 = arith.mulf %82, %82 : vector<32x1xf32>
    %86 = arith.subf %84, %85 : vector<32x1xf32>
    %cst_37 = arith.constant 0.000000e+00 : f32
    %87 = vector.broadcast %cst_37 : f32 to vector<32x1xf32>
    %88 = arith.maximumf %86, %87 : vector<32x1xf32>
    %89 = vector.broadcast %82 : vector<32x1xf32> to vector<32x16xf32>
    %90 = arith.subf %75, %89 : vector<32x16xf32>
    %cst_38 = arith.constant 9.99999974E-6 : f32
    %91 = vector.broadcast %cst_38 : f32 to vector<32x1xf32>
    %92 = arith.addf %88, %91 : vector<32x1xf32>
    %93 = math.rsqrt %92 : vector<32x1xf32>
    %94 = vector.broadcast %93 : vector<32x1xf32> to vector<32x16xf32>
    %95 = arith.mulf %90, %94 : vector<32x16xf32>
    %c0_39 = arith.constant 0 : index
    %c0_40 = arith.constant 0 : index
    %96 = vector.load %arg11[%c0_39, %c0_40] : memref<16x384xf32, #tpu.memory_space<vmem>>, vector<16x384xf32>
    %cst_41 = arith.constant dense<0.000000e+00> : vector<32x384xf32>
    %97 = tpu.matmul %95, %96, %cst_41 {dimension_numbers = #tpu.dot_dimension_numbers<[1], [0], [0], [1], [0, 0, 1, 1], [], []>} : vector<32x16xf32>, vector<16x384xf32>, vector<32x384xf32> -> vector<32x384xf32>
    %c0_42 = arith.constant 0 : index
    %c0_43 = arith.constant 0 : index
    %98 = vector.load %arg12[%c0_42, %c0_43] : memref<1x384xf32, #tpu.memory_space<vmem>>, vector<1x384xf32>
    %99 = vector.broadcast %98 : vector<1x384xf32> to vector<32x384xf32>
    %100 = arith.addf %97, %99 : vector<32x384xf32>
    %c0_44 = arith.constant 0 : index
    %c0_45 = arith.constant 0 : index
    %101 = vector.load %arg14[%c0_44, %c0_45] : memref<16x384xf32, #tpu.memory_space<vmem>>, vector<16x384xf32>
    %cst_46 = arith.constant dense<0.000000e+00> : vector<32x384xf32>
    %102 = tpu.matmul %29, %101, %cst_46 {dimension_numbers = #tpu.dot_dimension_numbers<[1], [0], [0], [1], [0, 0, 1, 1], [], []>} : vector<32x16xf32>, vector<16x384xf32>, vector<32x384xf32> -> vector<32x384xf32>
    %103 = arith.mulf %100, %102 : vector<32x384xf32>
    %c0_47 = arith.constant 0 : index
    %c0_48 = arith.constant 0 : index
    %104 = vector.load %arg15[%c0_47, %c0_48] : memref<384x24xf32, #tpu.memory_space<vmem>>, vector<384x24xf32>
    %cst_49 = arith.constant dense<0.000000e+00> : vector<32x24xf32>
    %105 = tpu.matmul %103, %104, %cst_49 {dimension_numbers = #tpu.dot_dimension_numbers<[1], [0], [0], [1], [0, 0, 1, 1], [], []>} : vector<32x384xf32>, vector<384x24xf32>, vector<32x24xf32> -> vector<32x24xf32>
    %c0_50 = arith.constant 0 : index
    %c0_51 = arith.constant 0 : index
    %106 = vector.load %arg13[%c0_50, %c0_51] : memref<24x24xf32, #tpu.memory_space<vmem>>, vector<24x24xf32>
    %cst_52 = arith.constant dense<0.000000e+00> : vector<32x24xf32>
    %107 = tpu.matmul %105, %106, %cst_52 {dimension_numbers = #tpu.dot_dimension_numbers<[1], [0], [0], [1], [0, 0, 1, 1], [], []>} : vector<32x24xf32>, vector<24x24xf32>, vector<32x24xf32> -> vector<32x24xf32>
    %108 = vector.extract_strided_slice %107 {offsets = [0, 0], sizes = [32, 8], strides = [1, 1]} : vector<32x24xf32> to vector<32x8xf32>
    %cst_53 = arith.constant 0.000000e+00 : f32
    %109 = vector.broadcast %cst_53 : f32 to vector<32x8xf32>
    %110 = arith.cmpf oge, %108, %109 : vector<32x8xf32>
    %cst_54 = arith.constant 1.000000e-01 : f32
    %111 = vector.broadcast %cst_54 : f32 to vector<32x8xf32>
    %112 = arith.mulf %111, %108 : vector<32x8xf32>
    %113 = arith.select %110, %108, %112 : vector<32x8xi1>, vector<32x8xf32>
    %c0_55 = arith.constant 0 : index
    %c0_56 = arith.constant 0 : index
    %114 = vector.load %arg17[%c0_55, %c0_56] : memref<8x2xf32, #tpu.memory_space<vmem>>, vector<8x2xf32>
    %cst_57 = arith.constant dense<0.000000e+00> : vector<32x2xf32>
    %115 = tpu.matmul %113, %114, %cst_57 {dimension_numbers = #tpu.dot_dimension_numbers<[1], [0], [0], [1], [0, 0, 1, 1], [], []>} : vector<32x8xf32>, vector<8x2xf32>, vector<32x2xf32> -> vector<32x2xf32>
    %cst_58 = arith.constant 0.353553385 : f32
    %116 = vector.broadcast %cst_58 : f32 to vector<32x2xf32>
    %117 = arith.mulf %115, %116 : vector<32x2xf32>
    %118 = vector.extract_strided_slice %19 {offsets = [0, 0], sizes = [8, 8], strides = [1, 1]} : vector<8x24xf32> to vector<8x8xf32>
    %cst_59 = arith.constant 0.000000e+00 : f32
    %119 = vector.broadcast %cst_59 : f32 to vector<8x8xf32>
    %120 = arith.cmpf oge, %118, %119 : vector<8x8xf32>
    %cst_60 = arith.constant 1.000000e-01 : f32
    %121 = vector.broadcast %cst_60 : f32 to vector<8x8xf32>
    %122 = arith.mulf %121, %118 : vector<8x8xf32>
    %123 = arith.select %120, %118, %122 : vector<8x8xi1>, vector<8x8xf32>
    %c0_61 = arith.constant 0 : index
    %c0_62 = arith.constant 0 : index
    %124 = vector.load %arg17[%c0_61, %c0_62] : memref<8x2xf32, #tpu.memory_space<vmem>>, vector<8x2xf32>
    %cst_63 = arith.constant dense<0.000000e+00> : vector<8x2xf32>
    %125 = tpu.matmul %123, %124, %cst_63 {dimension_numbers = #tpu.dot_dimension_numbers<[1], [0], [0], [1], [0, 0, 1, 1], [], []>} : vector<8x8xf32>, vector<8x2xf32>, vector<8x2xf32> -> vector<8x2xf32>
    %cst_64 = arith.constant 0.353553385 : f32
    %126 = vector.broadcast %cst_64 : f32 to vector<8x2xf32>
    %127 = arith.mulf %125, %126 : vector<8x2xf32>
    %c0_65 = arith.constant 0 : index
    %c0_66 = arith.constant 0 : index
    %c0_67 = arith.constant 0 : index
    %128 = vector.load %arg4[%c0_65, %c0_66, %c0_67] : memref<1x32x1xf32, #tpu.memory_space<vmem>>, vector<1x32x1xf32>
    %129 = vector.shape_cast %128 : vector<1x32x1xf32> to vector<32x1xf32>
    %cst_68 = arith.constant 1.000000e+00 : f32
    %130 = vector.broadcast %cst_68 : f32 to vector<32x1xf32>
    %131 = arith.subf %130, %129 : vector<32x1xf32>
    %cst_69 = arith.constant 1.000000e+30 : f32
    %132 = vector.broadcast %cst_69 : f32 to vector<32x1xf32>
    %133 = arith.mulf %131, %132 : vector<32x1xf32>
    %134 = vector.broadcast %133 : vector<32x1xf32> to vector<32x2xf32>
    %135 = arith.subf %117, %134 : vector<32x2xf32>
    %136 = vector.extract_strided_slice %107 {offsets = [0, 8], sizes = [32, 16], strides = [1, 1]} : vector<32x24xf32> to vector<32x16xf32>
    %137 = arith.negf %136 : vector<32x16xf32>
    %138 = math.exp %137 : vector<32x16xf32>
    %cst_70 = arith.constant 1.000000e+00 : f32
    %139 = vector.broadcast %cst_70 : f32 to vector<32x16xf32>
    %140 = arith.addf %139, %138 : vector<32x16xf32>
    %141 = arith.divf %139, %140 : vector<32x16xf32>
    %142 = arith.mulf %136, %141 : vector<32x16xf32>
    %c0_71 = arith.constant 0 : index
    %c0_72 = arith.constant 0 : index
    %143 = vector.load %arg18[%c0_71, %c0_72] : memref<16x16xf32, #tpu.memory_space<vmem>>, vector<16x16xf32>
    %cst_73 = arith.constant dense<0.000000e+00> : vector<32x16xf32>
    %144 = tpu.matmul %142, %143, %cst_73 {dimension_numbers = #tpu.dot_dimension_numbers<[1], [0], [0], [1], [0, 0, 1, 1], [], []>} : vector<32x16xf32>, vector<16x16xf32>, vector<32x16xf32> -> vector<32x16xf32>
    %145 = vector.extract_strided_slice %19 {offsets = [0, 8], sizes = [8, 16], strides = [1, 1]} : vector<8x24xf32> to vector<8x16xf32>
    %146 = arith.negf %145 : vector<8x16xf32>
    %147 = math.exp %146 : vector<8x16xf32>
    %cst_74 = arith.constant 1.000000e+00 : f32
    %148 = vector.broadcast %cst_74 : f32 to vector<8x16xf32>
    %149 = arith.addf %148, %147 : vector<8x16xf32>
    %150 = arith.divf %148, %149 : vector<8x16xf32>
    %151 = arith.mulf %145, %150 : vector<8x16xf32>
    %c0_75 = arith.constant 0 : index
    %c0_76 = arith.constant 0 : index
    %152 = vector.load %arg18[%c0_75, %c0_76] : memref<16x16xf32, #tpu.memory_space<vmem>>, vector<16x16xf32>
    %cst_77 = arith.constant dense<0.000000e+00> : vector<8x16xf32>
    %153 = tpu.matmul %151, %152, %cst_77 {dimension_numbers = #tpu.dot_dimension_numbers<[1], [0], [0], [1], [0, 0, 1, 1], [], []>} : vector<8x16xf32>, vector<16x16xf32>, vector<8x16xf32> -> vector<8x16xf32>
    %154 = vector.extract_strided_slice %135 {offsets = [0, 0], sizes = [8, 2], strides = [1, 1]} : vector<32x2xf32> to vector<8x2xf32>
    %155 = vector.extract_strided_slice %135 {offsets = [8, 0], sizes = [8, 2], strides = [1, 1]} : vector<32x2xf32> to vector<8x2xf32>
    %156 = vector.extract_strided_slice %135 {offsets = [16, 0], sizes = [8, 2], strides = [1, 1]} : vector<32x2xf32> to vector<8x2xf32>
    %157 = vector.extract_strided_slice %135 {offsets = [24, 0], sizes = [8, 2], strides = [1, 1]} : vector<32x2xf32> to vector<8x2xf32>
    %158 = arith.maximumf %127, %154 : vector<8x2xf32>
    %159 = arith.maximumf %158, %155 : vector<8x2xf32>
    %160 = arith.maximumf %159, %156 : vector<8x2xf32>
    %161 = arith.maximumf %160, %157 : vector<8x2xf32>
    %162 = arith.subf %127, %161 : vector<8x2xf32>
    %163 = math.exp %162 : vector<8x2xf32>
    %164 = arith.subf %154, %161 : vector<8x2xf32>
    %165 = math.exp %164 : vector<8x2xf32>
    %166 = arith.subf %155, %161 : vector<8x2xf32>
    %167 = math.exp %166 : vector<8x2xf32>
    %168 = arith.subf %156, %161 : vector<8x2xf32>
    %169 = math.exp %168 : vector<8x2xf32>
    %170 = arith.subf %157, %161 : vector<8x2xf32>
    %171 = math.exp %170 : vector<8x2xf32>
    %172 = arith.addf %163, %165 : vector<8x2xf32>
    %173 = arith.addf %172, %167 : vector<8x2xf32>
    %174 = arith.addf %173, %169 : vector<8x2xf32>
    %175 = arith.addf %174, %171 : vector<8x2xf32>
    %cst_78 = arith.constant 1.000000e+00 : f32
    %176 = vector.broadcast %cst_78 : f32 to vector<8x2xf32>
    %177 = arith.divf %176, %175 : vector<8x2xf32>
    %178 = tpu.concatenate %163, %165, %167, %169, %171 in 0 : vector<8x2xf32>, vector<8x2xf32>, vector<8x2xf32>, vector<8x2xf32>, vector<8x2xf32> -> vector<40x2xf32>
    %179 = tpu.concatenate %153, %144 in 0 : vector<8x16xf32>, vector<32x16xf32> -> vector<40x16xf32>
    %c0_79 = arith.constant 0 : index
    %c0_80 = arith.constant 0 : index
    %180 = vector.load %arg16[%c0_79, %c0_80] : memref<2x16xf32, #tpu.memory_space<vmem>>, vector<2x16xf32>
    %cst_81 = arith.constant dense<0.000000e+00> : vector<40x16xf32>
    %181 = tpu.matmul %178, %180, %cst_81 {dimension_numbers = #tpu.dot_dimension_numbers<[1], [0], [0], [1], [0, 0, 1, 1], [], []>} : vector<40x2xf32>, vector<2x16xf32>, vector<40x16xf32> -> vector<40x16xf32>
    %182 = arith.mulf %181, %179 : vector<40x16xf32>
    %183 = vector.extract_strided_slice %182 {offsets = [0, 0], sizes = [8, 16], strides = [1, 1]} : vector<40x16xf32> to vector<8x16xf32>
    %184 = vector.extract_strided_slice %182 {offsets = [8, 0], sizes = [8, 16], strides = [1, 1]} : vector<40x16xf32> to vector<8x16xf32>
    %185 = arith.addf %183, %184 : vector<8x16xf32>
    %186 = vector.extract_strided_slice %182 {offsets = [16, 0], sizes = [8, 16], strides = [1, 1]} : vector<40x16xf32> to vector<8x16xf32>
    %187 = arith.addf %185, %186 : vector<8x16xf32>
    %188 = vector.extract_strided_slice %182 {offsets = [24, 0], sizes = [8, 16], strides = [1, 1]} : vector<40x16xf32> to vector<8x16xf32>
    %189 = arith.addf %187, %188 : vector<8x16xf32>
    %190 = vector.extract_strided_slice %182 {offsets = [32, 0], sizes = [8, 16], strides = [1, 1]} : vector<40x16xf32> to vector<8x16xf32>
    %191 = arith.addf %189, %190 : vector<8x16xf32>
    %c0_82 = arith.constant 0 : index
    %c0_83 = arith.constant 0 : index
    %192 = vector.load %arg16[%c0_82, %c0_83] : memref<2x16xf32, #tpu.memory_space<vmem>>, vector<2x16xf32>
    %cst_84 = arith.constant dense<0.000000e+00> : vector<8x16xf32>
    %193 = tpu.matmul %177, %192, %cst_84 {dimension_numbers = #tpu.dot_dimension_numbers<[1], [0], [0], [1], [0, 0, 1, 1], [], []>} : vector<8x2xf32>, vector<2x16xf32>, vector<8x16xf32> -> vector<8x16xf32>
    %194 = arith.mulf %191, %193 : vector<8x16xf32>
    %c0_85 = arith.constant 0 : index
    %c0_86 = arith.constant 0 : index
    %195 = vector.load %arg19[%c0_85, %c0_86] : memref<16x16xf32, #tpu.memory_space<vmem>>, vector<16x16xf32>
    %cst_87 = arith.constant dense<0.000000e+00> : vector<8x16xf32>
    %196 = tpu.matmul %194, %195, %cst_87 {dimension_numbers = #tpu.dot_dimension_numbers<[1], [0], [0], [1], [0, 0, 1, 1], [], []>} : vector<8x16xf32>, vector<16x16xf32>, vector<8x16xf32> -> vector<8x16xf32>
    %197 = vector.extract_strided_slice %196 {offsets = [0, 0], sizes = [1, 16], strides = [1, 1]} : vector<8x16xf32> to vector<1x16xf32>
    %198 = vector.extract_strided_slice %196 {offsets = [1, 0], sizes = [1, 16], strides = [1, 1]} : vector<8x16xf32> to vector<1x16xf32>
    %199 = vector.extract_strided_slice %196 {offsets = [2, 0], sizes = [1, 16], strides = [1, 1]} : vector<8x16xf32> to vector<1x16xf32>
    %200 = vector.extract_strided_slice %196 {offsets = [3, 0], sizes = [1, 16], strides = [1, 1]} : vector<8x16xf32> to vector<1x16xf32>
    %201 = vector.extract_strided_slice %196 {offsets = [4, 0], sizes = [1, 16], strides = [1, 1]} : vector<8x16xf32> to vector<1x16xf32>
    %202 = vector.extract_strided_slice %196 {offsets = [5, 0], sizes = [1, 16], strides = [1, 1]} : vector<8x16xf32> to vector<1x16xf32>
    %203 = vector.extract_strided_slice %196 {offsets = [6, 0], sizes = [1, 16], strides = [1, 1]} : vector<8x16xf32> to vector<1x16xf32>
    %204 = vector.extract_strided_slice %196 {offsets = [7, 0], sizes = [1, 16], strides = [1, 1]} : vector<8x16xf32> to vector<1x16xf32>
    %205 = tpu.concatenate %197, %198, %199, %200, %201, %202, %203, %204 in 1 : vector<1x16xf32>, vector<1x16xf32>, vector<1x16xf32>, vector<1x16xf32>, vector<1x16xf32>, vector<1x16xf32>, vector<1x16xf32>, vector<1x16xf32> -> vector<1x128xf32>
    %c0_88 = arith.constant 0 : index
    %c0_89 = arith.constant 0 : index
    %c0_90 = arith.constant 0 : index
    %206 = vector.load %arg20[%c0_88, %c0_89, %c0_90] : memref<1x1x128xf32, #tpu.memory_space<vmem>>, vector<1x1x128xf32>
    %207 = vector.shape_cast %206 : vector<1x1x128xf32> to vector<1x128xf32>
    %208 = vector.shape_cast %205 : vector<1x128xf32> to vector<1x1x128xf32>
    tpu.vector_store %arg20[%c0_88, %c0_89, %c0_90], %208 {strides = array<i32>} : memref<1x1x128xf32, #tpu.memory_space<vmem>>, vector<1x1x128xf32>,
    return
  }
  func.func @transform_0(%arg0: i32) -> (i32, i32, i32) {
    %c0_i32 = arith.constant 0 : i32
    %c0_i32_0 = arith.constant 0 : i32
    %c0_i32_1 = arith.constant 0 : i32
    return %arg0, %c0_i32, %c0_i32_0 : i32, i32, i32
  }
  func.func @transform_1(%arg0: i32) -> (i32, i32, i32) {
    %c0_i32 = arith.constant 0 : i32
    %c0_i32_0 = arith.constant 0 : i32
    %c0_i32_1 = arith.constant 0 : i32
    return %arg0, %c0_i32, %c0_i32_0 : i32, i32, i32
  }
  func.func @transform_2(%arg0: i32) -> (i32, i32, i32) {
    %c0_i32 = arith.constant 0 : i32
    %c0_i32_0 = arith.constant 0 : i32
    %c0_i32_1 = arith.constant 0 : i32
    return %arg0, %c0_i32, %c0_i32_0 : i32, i32, i32
  }
  func.func @transform_3(%arg0: i32) -> (i32, i32, i32) {
    %c0_i32 = arith.constant 0 : i32
    %c0_i32_0 = arith.constant 0 : i32
    %c0_i32_1 = arith.constant 0 : i32
    return %arg0, %c0_i32, %c0_i32_0 : i32, i32, i32
  }
  func.func @transform_4(%arg0: i32) -> (i32, i32) {
    %c0_i32 = arith.constant 0 : i32
    %c0_i32_0 = arith.constant 0 : i32
    %c0_i32_1 = arith.constant 0 : i32
    return %c0_i32, %c0_i32_0 : i32, i32
  }
  func.func @transform_5(%arg0: i32) -> (i32, i32) {
    %c0_i32 = arith.constant 0 : i32
    %c0_i32_0 = arith.constant 0 : i32
    %c0_i32_1 = arith.constant 0 : i32
    return %c0_i32, %c0_i32_0 : i32, i32
  }
  func.func @transform_6(%arg0: i32) -> (i32, i32) {
    %c0_i32 = arith.constant 0 : i32
    %c0_i32_0 = arith.constant 0 : i32
    %c0_i32_1 = arith.constant 0 : i32
    return %c0_i32, %c0_i32_0 : i32, i32
  }
  func.func @transform_7(%arg0: i32) -> (i32, i32) {
    %c0_i32 = arith.constant 0 : i32
    %c0_i32_0 = arith.constant 0 : i32
    %c0_i32_1 = arith.constant 0 : i32
    return %c0_i32, %c0_i32_0 : i32, i32
  }
  func.func @transform_8(%arg0: i32) -> (i32, i32) {
    %c0_i32 = arith.constant 0 : i32
    %c0_i32_0 = arith.constant 0 : i32
    %c0_i32_1 = arith.constant 0 : i32
    return %c0_i32, %c0_i32_0 : i32, i32
  }
  func.func @transform_9(%arg0: i32) -> (i32, i32) {
    %c0_i32 = arith.constant 0 : i32
    %c0_i32_0 = arith.constant 0 : i32
    %c0_i32_1 = arith.constant 0 : i32
    return %c0_i32, %c0_i32_0 : i32, i32
  }
  func.func @transform_10(%arg0: i32) -> (i32, i32) {
    %c0_i32 = arith.constant 0 : i32
    %c0_i32_0 = arith.constant 0 : i32
    %c0_i32_1 = arith.constant 0 : i32
    return %c0_i32, %c0_i32_0 : i32, i32
  }
  func.func @transform_11(%arg0: i32) -> (i32, i32) {
    %c0_i32 = arith.constant 0 : i32
    %c0_i32_0 = arith.constant 0 : i32
    %c0_i32_1 = arith.constant 0 : i32
    return %c0_i32, %c0_i32_0 : i32, i32
  }
  func.func @transform_12(%arg0: i32) -> (i32, i32) {
    %c0_i32 = arith.constant 0 : i32
    %c0_i32_0 = arith.constant 0 : i32
    %c0_i32_1 = arith.constant 0 : i32
    return %c0_i32, %c0_i32_0 : i32, i32
  }
  func.func @transform_13(%arg0: i32) -> (i32, i32) {
    %c0_i32 = arith.constant 0 : i32
    %c0_i32_0 = arith.constant 0 : i32
    %c0_i32_1 = arith.constant 0 : i32
    return %c0_i32, %c0_i32_0 : i32, i32
  }
  func.func @transform_14(%arg0: i32) -> (i32, i32) {
    %c0_i32 = arith.constant 0 : i32
    %c0_i32_0 = arith.constant 0 : i32
    %c0_i32_1 = arith.constant 0 : i32
    return %c0_i32, %c0_i32_0 : i32, i32
  }
  func.func @transform_15(%arg0: i32) -> (i32, i32) {
    %c0_i32 = arith.constant 0 : i32
    %c0_i32_0 = arith.constant 0 : i32
    %c0_i32_1 = arith.constant 0 : i32
    return %c0_i32, %c0_i32_0 : i32, i32
  }
  func.func @transform_16(%arg0: i32) -> (i32, i32) {
    %c0_i32 = arith.constant 0 : i32
    %c0_i32_0 = arith.constant 0 : i32
    %c0_i32_1 = arith.constant 0 : i32
    return %c0_i32, %c0_i32_0 : i32, i32
  }
  func.func @transform_17(%arg0: i32) -> (i32, i32) {
    %c0_i32 = arith.constant 0 : i32
    %c0_i32_0 = arith.constant 0 : i32
    %c0_i32_1 = arith.constant 0 : i32
    return %c0_i32, %c0_i32_0 : i32, i32
  }
  func.func @transform_18(%arg0: i32) -> (i32, i32) {
    %c0_i32 = arith.constant 0 : i32
    %c0_i32_0 = arith.constant 0 : i32
    %c0_i32_1 = arith.constant 0 : i32
    return %c0_i32, %c0_i32_0 : i32, i32
  }
  func.func @transform_19(%arg0: i32) -> (i32, i32, i32) {
    %c0_i32 = arith.constant 0 : i32
    %c0_i32_0 = arith.constant 0 : i32
    %c0_i32_1 = arith.constant 0 : i32
    return %arg0, %c0_i32, %c0_i32_0 : i32, i32, i32
  }
}

</mosaic_0001>

<bundles_post_ra>
// kernel: mlp_attention_forward.1
= control target key start
LH: loop header
LB: loop body
LE: loop exit
PB: predicated region body
PF: predicated region fallthrough
CT: control target
= control target key end

     0   :  { %s3990_s0 = inlined_call_operand.vmem [shape: f32[2,8,16], index: 0, kind: input, shape index: {}]   ;;  %s3991_s1 = inlined_call_operand.vmem [shape: s32[2,32,1], index: 1, kind: input, shape index: {}]   ;;  %s3992_s2 = inlined_call_operand.vmem [shape: f32[2,32,1], index: 2, kind: input, shape index: {}]   ;;  %s3993_s3 = inlined_call_operand.vmem [shape: f32[2,32,1], index: 3, kind: input, shape index: {}]   ;;  %s3994_s4 = inlined_call_operand.vmem [shape: f32[1,16], index: 4, kind: input, shape index: {}]   ;;  %s3995_s5 = inlined_call_operand.vmem [shape: f32[16,56], index: 5, kind: input, shape index: {}]   ;;  %s3996_s6 = inlined_call_operand.vmem [shape: f32[1,16], index: 6, kind: input, shape index: {}]   ;;  %s3997_s7 = inlined_call_operand.vmem [shape: f32[1,16], index: 7, kind: input, shape index: {}]   ;;  %s3998_s8 = inlined_call_operand.vmem [shape: f32[16,16], index: 8, kind: input, shape index: {}]   ;;  %s3999_s9 = inlined_call_operand.vmem [shape: f32[1,16], index: 9, kind: input, shape index: {}]   ;;  %s4000_s10 = inlined_call_operand.vmem [shape: f32[16,384], index: 10, kind: input, shape index: {}]   ;;  %s4001_s11 = inlined_call_operand.vmem [shape: f32[1,384], index: 11, kind: input, shape index: {}]   ;;  %s4002_s12 = inlined_call_operand.vmem [shape: f32[24,24], index: 12, kind: input, shape index: {}]   ;;  %s4003_s13 = inlined_call_operand.vmem [shape: f32[16,384], index: 13, kind: input, shape index: {}]   ;;  %s4004_s14 = inlined_call_operand.vmem [shape: f32[384,24], index: 14, kind: input, shape index: {}]   ;;  %s4005_s15 = inlined_call_operand.vmem [shape: f32[2,16], index: 15, kind: input, shape index: {}]   ;;  %s4006_s16 = inlined_call_operand.vmem [shape: f32[8,2], index: 16, kind: input, shape index: {}]   ;;  %s4007_s17 = inlined_call_operand.vmem [shape: f32[16,16], index: 17, kind: input, shape index: {}]   ;;  %s4008_s18 = inlined_call_operand.vmem [shape: f32[16,16], index: 18, kind: input, shape index: {}]   ;;  %s4009_s19 = inlined_call_operand.vmem [shape: f32[2,1,128], index: 19, kind: output, shape index: {}]  }
   0x1   :  { %4010 = sst [smem:[#allocation2_spill]] %s3990_s0  ;;  %s3515_s0 = smov 0  }
   0x2   :  { %4011 = sst [smem:[#allocation3_spill]] %s3991_s1 }
   0x3   :  { %4012 = sst [smem:[#allocation4_spill]] %s3992_s2 }
   0x4   :  { %4013 = sst [smem:[#allocation5_spill]] %s3993_s3 }
   0x5 LB: > { %s2822_s30 = sadd.s32 4294967295, %s3400_s0   ;;  %p2826_p0 = scmp.ge.s32.totalorder %s3400_s0, 1  ;;  %s3400_s0 = sphi %s3515_s0, %s29_s0  }
   0x6   : > { %p566_p1 = scmp.lt.s32.totalorder %s3400_s0, 3 }
   0x8   : > { %p567_p2 = pnand %p2826_p0, %p566_p1 }
   0x9   : > { %p634_p3 = scmp.lt.s32.totalorder (!%p567_p2), %s2822_s30, 1  ;;  %v3402_v0 = vmov (!%p567_p2), 0   ;;  %s4014_s2 = sld [smem:[#allocation4_spill]] (!%p567_p2)  ;;  %vm658_vm0 = vcmask (!%p567_p2), 130048   ;;  %v681_v8 = vld [vmem:[%s3995_s5] sm:$0xff] (!%p567_p2)  ;;  %v682_v9 = vld [vmem:[%s3995_s5 + $0x8] sm:$0xff] (!%p567_p2) }
   0xa   : > { %570 = sbr.rel (%p567_p2) target bundleno = 2288 (0x8f0), region = 96  ;;  %3309 = vset.pattern.permute.xlu1 (!%p567_p2), %v3402_v0  ;;  %3308 = vset.pattern.permute.xlu0 (!%p567_p2), %v3402_v0  ;;  %s4015_s3 = sld [smem:[#allocation2_spill]] (!%p567_p2)  ;;  %v3187_v10 = vpack.c.bf16 (!%p567_p2), %v682_v9, %v681_v8  ;;  %v3403_v11 = vmov (!%p567_p2), 0.0|0.0   ;;  %vm3404_vm1 = vmmov (!%p567_p2), 0   ;;  %v3405_v12 = vmov (!%p567_p2), 0.0  }
   0xb   : > { %3186 = vmatprep.subr.bf16.mxu1 (!%p567_p2), %v3403_v11  ;;  %3036 = vmatprep.mubr.msk.f32.mxu1 (!%p567_p2), %vm3404_vm1, %v3405_v12  ;;  %v2844_v13 = vld [vmem:[%s3996_s6] ss:$0 sm:$0xff] (!%p567_p2)  ;;  %s4016_s27 = sld [smem:[#allocation3_spill]] (!%p567_p2)  ;;  %vm790_vm4 = vcmask (!%p567_p2), 64512   ;;  %s3408_s29 = smov (!%p567_p2), 88   ;;  %vm1858_vm10 = vcmask (!%p567_p2), 195584  }
   0xc   : > { %3188 = vmatpush3.bf16.msra.mxu1 (!%p567_p2), %v3187_v10  ;;  %v2845_v14 = vld [vmem:[%s3997_s7] ss:$0 sm:$0xff] (!%p567_p2)  ;;  %s3409_s1 = smov (!%p567_p2), 120   ;;  %vm2444_vm15 = vcmask (!%p567_p2), 1041408  }
   0xd   : > { %v2834_v51 = vld [vmem:[%s3994_s4] ss:$0 sm:$0xff] (!%p567_p2) }
   0xe   : > { %v1026_v10 = vld [vmem:[%s3998_s8] sm:$0xff] (!%p567_p2) }
  0x11   : > { %s4019_s30 = smov (!%p634_p3, %s2822_s30), 1 }
  0x12   : > { %s3526_s20 = sshll.u32 %s4019_s30, 5  ;;  %s2827_s21 = sshll.u32 %s4019_s30, 3 }
  0x13   : > { %s647_s23 = scalar_lea.vmem %s4014_s2, %s3526_s20  ;;  %s637_s26 = scalar_lea.vmem %s4015_s3, %s2827_s21 }
  0x14   : > { %v889_v1 = vld [vmem:[%s647_s23 + $0x8] sm:$0xff]  ;;  %v3536_v2 = vld [vmem:[%s637_s26] sm:$0xff]  ;;  %v890_v4 = vld [vmem:[%s647_s23 + $0x10] sm:$0xff]  ;;  %s3568_s28 = scalar_lea.vmem %s4016_s27, %s3526_s20  ;;  %s3406_s2 = smov 112  }
  0x15   : > { %900 = vperm.xlu1 %3309, %v889_v1   ;;  %v657_v3 = vmul.f32 %v3536_v2, %v3536_v2  ;;  %v891_v6 = vld [vmem:[%s647_s23 + $0x18] sm:$0xff]  ;;  %v888_v7 = vld [vmem:[%s647_s23] sm:$0xff]  ;;  %v757_v54 = vld [vmem:[%s3568_s28 + $0x8] sm:$0xff]  ;;  %s4017_s26 = sld [smem:[#allocation5_spill]]  ;;  %s3413_s21 = smov 48  }
  0x16   : > { %v756_v8 = vld [vmem:[%s3568_s28] sm:$0xff]  ;;  %v758_v9 = vld [vmem:[%s3568_s28 + $0x10] sm:$0xff]  ;;  %s655_s22 = scalar_lea.vmem %s4009_s19, %s4019_s30 }
  0x17   : > { %v659_v5 = vsel %vm658_vm0, %v657_v3, 0.0 }
  0x18   : > { %660 = vadd.xlane.f32.xlu0 %v659_v5 }
  0x19   : > { %905 = vperm.xlu1 %3309, %v890_v4  }
  0x1b   : > { %s652_s27 = scalar_lea.vmem %s4017_s26, %s3526_s20  ;;  %s3411_s20 = smov 16  }
  0x1d   : > { %910 = vperm.xlu1 %3309, %v891_v6  }
  0x2e   : > { %895 = vperm.xlu0 %3308, %v888_v7  }
  0x94   : > { %v901_v15 = vpop.permute.xlu1 %900 }
  0x95   : > { %v920_v16 = vmul.f32 %v2844_v13, %v901_v15 }
  0x97   : > { %v931_v17 = vadd.f32 %v2845_v14, %v920_v16 }
  0x98   : > { %v906_v19 = vpop.permute.xlu1 %905 }
  0x99   : > { %v2847_v18 = vmul.f32 -1.442695, %v931_v17  ;;  %v921_v20 = vmul.f32 %v2844_v13, %v906_v19 }
  0x9b   : > { %3310 = vpow2.f32 %v2847_v18  ;;  %v932_v25 = vadd.f32 %v2845_v14, %v921_v20 }
  0x9c   : > { %v911_v21 = vpop.permute.xlu1 %910 }
  0x9d   : > { %v922_v26 = vmul.f32 %v2844_v13, %v911_v21  ;;  %v2848_v27 = vmul.f32 -1.442695, %v932_v25 }
  0x9f   : > { %v933_v28 = vadd.f32 %v2845_v14, %v922_v26 }
  0xa1   : > { %v2849_v31 = vmul.f32 -1.442695, %v933_v28 }
  0xa5   : > { %v3311_v22 = vpop.eup %3310  ;;  %v661_v23 = vpop.xlane.xlu0 %660 }
  0xa6   : > { %v947_v24 = vadd.f32 1.0, %v3311_v22  ;;  %3312 = vrsqrt.f32 %v661_v23  ;;  %vm664_vm2 = vcmp.eq.f32.partialorder %v661_v23, inf  ;;  %v667_v36 = vand.u32 2147483648, %v661_v23 }
  0xa7   : > { %vm666_vm3 = vcmp.eq.f32.partialorder %v661_v23, 0.0 }
  0xa8   : > { %3314 = vrcp.f32 %v947_v24 }
  0xa9   : > { %3316 = vpow2.f32 %v2848_v27 }
  0xaa   : > { %3318 = vpow2.f32 %v2849_v31 }
  0xad   : > { %v896_v29 = vpop.permute.xlu0 %895 }
  0xae   : > { %v919_v30 = vmul.f32 %v2844_v13, %v896_v29  ;;  %v1027_v13 = vld [vmem:[%s3998_s8 + $0x8] sm:$0xff] }
  0xb0   : > { %v3313_v32 = vpop.eup %3312  ;;  %v930_v33 = vadd.f32 %v2845_v14, %v919_v30  ;;  %v3189_v14 = vpack.c.bf16 %v1027_v13, %v1026_v10 }
  0xb1   : > { %v663_v34 = vmul.f32 %v3313_v32, %v661_v23 }
  0xb2   : > { %v3315_v35 = vpop.eup %3314  ;;  %v2846_v37 = vmul.f32 -1.442695, %v930_v33  ;;  %3190 = vmatprep.subr.bf16.mxu0 %v3189_v14 }
  0xb3   : > { %v3556_v38 = vmul.f32 %v3315_v35, %v931_v17  ;;  %v665_v39 = vsel %vm664_vm2, %v661_v23, %v663_v34  ;;  %v3317_v44 = vpop.eup %3316  ;;  %3192 = vmatpush3.bf16.msra.mxu0 %v3189_v14  ;;  %vm2428_vm2 = vcmask 15360  }
  0xb4   : > { %v668_v40 = vsel %vm666_vm3, %v667_v36, %v665_v39  ;;  %3320 = vpow2.f32 %v2846_v37  ;;  %v948_v45 = vadd.f32 1.0, %v3317_v44  ;;  %v3319_v46 = vpop.eup %3318  ;;  %v760_v37 = vlaneseq }
  0xb5   : > { %v669_v41 = vmul.f32 0.25, %v668_v40  ;;  %v965_v42 = vsel %vm658_vm0, %v3556_v38, 0.0  ;;  %v949_v49 = vadd.f32 1.0, %v3319_v46  ;;  %vm2728_vm3 = vcmask 392192  }
  0xb6   : > { %966 = vadd.xlane.f32.xlu0 %v965_v42 }
  0xb7   : > { %v670_v43 = vmax.f32 %v669_v41, 1e-12 }
  0xb9   : > { %3322 = vrcp.f32 %v670_v43 }
  0xba   : > { %3324 = vrcp.f32 %v948_v45  ;;  %v761_v45 = vand.u32 127, %v760_v37 }
  0xbe   : > { %v3321_v47 = vpop.eup %3320 }
  0xbf   : > { %v946_v48 = vadd.f32 1.0, %v3321_v47 }
  0xc1   : > { %3326 = vrcp.f32 %v946_v48 }
  0xc2   : > { %3328 = vrcp.f32 %v949_v49 }
  0xc3   : > { %v3323_v50 = vpop.eup %3322 }
  0xc4   : > { %v672_v52 = vmul.f32 %v3323_v50, %v3536_v2  ;;  %v3325_v55 = vpop.eup %3324  ;;  %v975_v2 = vmul.f32 %v3556_v38, %v3556_v38 }
  0xc5   : > { %v3574_v58 = vmul.f32 %v3325_v55, %v932_v25 }
  0xc6   : > { %v680_v53 = vmul.f32 %v2834_v51, %v672_v52  ;;  %v981_v3 = vsel %vm658_vm0, %v975_v2, 0.0 }
  0xc7   : > { %v968_v62 = vsel %vm658_vm0, %v3574_v58, 0.0  ;;  %v976_v4 = vmul.f32 %v3574_v58, %v3574_v58 }
  0xc8   : > { %3037 = vmatmul.mubr.msk.f32.vlgmr.msra.gmra.mrb[0].mxu1 %vm658_vm0, %v680_v53 }
  0xc9   : > { %v984_v5 = vsel %vm658_vm0, %v976_v4, 0.0 }
  0xcb   : > { %v3327_v56 = vpop.eup %3326 }
  0xcc   : > { %v3572_v57 = vmul.f32 %v3327_v56, %v930_v33  ;;  %766 = vperm.xlu0 %3308, %v757_v54   ;;  %v3329_v60 = vpop.eup %3328 }
  0xcd   : > { %v3578_v61 = vmul.f32 %v3329_v60, %v933_v28 }
  0xce   : > { %v962_v59 = vsel %vm658_vm0, %v3572_v57, 0.0  ;;  %v974_v0 = vmul.f32 %v3572_v57, %v3572_v57 }
  0xcf   : > { %963 = vadd.xlane.f32.xlu1 %v962_v59  ;;  %v971_v63 = vsel %vm658_vm0, %v3578_v61, 0.0  ;;  %v977_v6 = vmul.f32 %v3578_v61, %v3578_v61 }
  0xd0   : > { %v978_v1 = vsel %vm658_vm0, %v974_v0, 0.0 }
  0xd1   : > { %v987_v7 = vsel %vm658_vm0, %v977_v6, 0.0 }
  0xd3   : > { %969 = vadd.xlane.f32.xlu1 %v968_v62 }
  0xd7   : > { %972 = vadd.xlane.f32.xlu1 %v971_v63 }
  0xdb   : > { %979 = vadd.xlane.f32.xlu1 %v978_v1 }
  0xdf   : > { %982 = vadd.xlane.f32.xlu1 %v981_v3 }
  0xe3   : > { %985 = vadd.xlane.f32.xlu1 %v984_v5 }
  0xe7   : > { %988 = vadd.xlane.f32.xlu1 %v987_v7 }
  0xf8   : > { %763 = vperm.xlu1 %3309, %v756_v8  }
  0xfc   : > { %769 = vperm.xlu1 %3309, %v758_v9   ;;  %v2850_v9 = vld [vmem:[%s3999_s9] ss:$0 sm:$0xff] }
 0x143   : > { %v967_v19 = vpop.xlane.xlu0 %966 }
 0x144   : > { %v991_v21 = vmul.f32 0.0625, %v967_v19 }
 0x146   : > { %v999_v27 = vmul.f32 %v991_v21, %v991_v21  ;;  %v1011_v55 = vsub.f32 %v3556_v38, %v991_v21 }
 0x14b   : > { %v767_v3 = vpop.permute.xlu0 %766 }
 0x14c   : > { %vm775_vm6 = vcmp.eq.s32.totalorder %v767_v3, %v761_v45  ;;  %v2152_v3 = vld [vmem:[%s652_s27 + $0x18] sm:$0xff] }
 0x14d   : > { %v2837_v5 = vsel %vm775_vm6, 1.0, %v3405_v12  ;;  %vm2734_vm6 = vcmask 785408  }
 0x15c   : > { %v964_v15 = vpop.xlane.xlu1 %963 }
 0x15d   : > { %v990_v18 = vmul.f32 0.0625, %v964_v15 }
 0x15f   : > { %v998_v22 = vmul.f32 %v990_v18, %v990_v18  ;;  %v1010_v50 = vsub.f32 %v3572_v57, %v990_v18 }
 0x160   : > { %v970_v16 = vpop.xlane.xlu1 %969 }
 0x161   : > { %v992_v25 = vmul.f32 0.0625, %v970_v16 }
 0x163   : > { %v1000_v32 = vmul.f32 %v992_v25, %v992_v25  ;;  %v1012_v60 = vsub.f32 %v3574_v58, %v992_v25  ;;  %v759_v58 = vld [vmem:[%s3568_s28 + $0x18] sm:$0xff]  ;;  %s3407_s28 = smov 96  }
 0x164   : > { %v973_v17 = vpop.xlane.xlu1 %972 }
 0x165   : > { %v993_v34 = vmul.f32 0.0625, %v973_v17 }
 0x167   : > { %v1001_v42 = vmul.f32 %v993_v34, %v993_v34  ;;  %v1013_v63 = vsub.f32 %v3578_v61, %v993_v34 }
 0x168   : > { %v980_v20 = vpop.xlane.xlu1 %979 }
 0x169   : > { %v994_v23 = vmul.f32 0.0625, %v980_v20 }
 0x16b   : > { %v1002_v24 = vsub.f32 %v994_v23, %v998_v22 }
 0x16c   : > { %v983_v26 = vpop.xlane.xlu1 %982 }
 0x16d   : > { %v1006_v28 = vmax.f32 %v1002_v24, 0.0  ;;  %v995_v29 = vmul.f32 0.0625, %v983_v26 }
 0x16f   : > { %v1014_v30 = vadd.f32 1e-05, %v1006_v28  ;;  %v1003_v31 = vsub.f32 %v995_v29, %v999_v27 }
 0x170   : > { %v986_v33 = vpop.xlane.xlu1 %985 }
 0x171   : > { %3330 = vrsqrt.f32 %v1014_v30  ;;  %v1007_v35 = vmax.f32 %v1003_v31, 0.0  ;;  %v996_v36 = vmul.f32 0.0625, %v986_v33 }
 0x173   : > { %v1015_v39 = vadd.f32 1e-05, %v1007_v35  ;;  %v1004_v40 = vsub.f32 %v996_v36, %v1000_v32 }
 0x174   : > { %v989_v41 = vpop.xlane.xlu1 %988 }
 0x175   : > { %3332 = vrsqrt.f32 %v1015_v39  ;;  %v1008_v43 = vmax.f32 %v1004_v40, 0.0  ;;  %v997_v44 = vmul.f32 0.0625, %v989_v41 }
 0x177   : > { %v1016_v46 = vadd.f32 1e-05, %v1008_v43  ;;  %v1005_v47 = vsub.f32 %v997_v44, %v1001_v42 }
 0x178   : > { %v764_v48 = vpop.permute.xlu1 %763 }
 0x179   : > { %3334 = vrsqrt.f32 %v1016_v46  ;;  %v1009_v49 = vmax.f32 %v1005_v47, 0.0  ;;  %vm774_vm5 = vcmp.eq.s32.totalorder %v764_v48, %v761_v45 }
 0x17a   : > { %v2836_v51 = vsel %vm774_vm5, 1.0, %v3405_v12  ;;  %vm2732_vm5 = vcmask 654336  }
 0x17b   : > { %v3331_v52 = vpop.eup %3330  ;;  %v1017_v53 = vadd.f32 1e-05, %v1009_v49  ;;  %3041 = vmatprep.mubr.msk.f32.mxu1 %vm790_vm4, %v2836_v51 }
 0x17c   : > { %v1022_v54 = vmul.f32 %v3331_v52, %v1010_v50  ;;  %v770_v4 = vpop.permute.xlu1 %769 }
 0x17d   : > { %3336 = vrsqrt.f32 %v1017_v53  ;;  %vm776_vm7 = vcmp.eq.s32.totalorder %v770_v4, %v761_v45 }
 0x17e   : > { %3051 = vmatprep.mubr.msk.f32.mxu0 %vm658_vm0, %v1022_v54  ;;  %v2838_v6 = vsel %vm776_vm7, 1.0, %v3405_v12  ;;  %vm2736_vm7 = vcmask 916480  }
 0x17f   : > { %v3333_v56 = vpop.eup %3332 }
 0x180   : > { %v1023_v59 = vmul.f32 %v3333_v56, %v1011_v55  ;;  %v2150_v56 = vld [vmem:[%s652_s27 + $0x8] sm:$0xff] }
 0x182   : > { %3052 = vmatmul.mubr.msk.f32.vlgmr.msra.gmra.mrb[0].mxu0 %vm658_vm0, %v1023_v59 }
 0x183   : > { %v3335_v57 = vpop.eup %3334 }
 0x184   : > { %v1024_v62 = vmul.f32 %v3335_v57, %v1012_v60  ;;  %v2154_v57 = vsub.f32 1.0, %v2150_v56 }
 0x186   : > { %3054 = vmatprep.mubr.msk.f32.mxu0 %vm658_vm0, %v1024_v62  ;;  %v2151_v62 = vld [vmem:[%s652_s27 + $0x10] sm:$0xff] }
 0x187   : > { %v3337_v0 = vpop.eup %3336 }
 0x188   : > { %v1025_v1 = vmul.f32 %v3337_v0, %v1013_v63  ;;  %v2149_v63 = vld [vmem:[%s652_s27] sm:$0xff]  ;;  %s3410_s27 = smov 32  }
 0x18a   : > { %3055 = vmatmul.mubr.msk.f32.gmra.mrb[2].mxu0 %vm658_vm0, %v1025_v1  ;;  %v2158_v1 = vmul.f32 1e+30, %v2154_v57 }
 0x19b   : > { %v3615_v38 = vpop.f32.mrb[0].mxu1 }
 0x19c   : > { %v3038_v2 = vpop.f32.mrb[1].mxu1  ;;  %787 = vrot.lane.b32.xlu1 %v3615_v38, %s3406_s2  ;;  %v2892_v46 = vmul.f32 -1.442695, %v3615_v38  ;;  %v2071_v60 = vmul.f32 0.1, %v3615_v38  ;;  %vm2070_vm9 = vcmp.ge.f32.partialorder %v3615_v38, 0.0 }
 0x19d   : > { %v2155_v2 = vsub.f32 1.0, %v2151_v62 }
 0x19e   : > { %v2072_v0 = vsel %vm2070_vm9, %v3615_v38, %v2071_v60 }
 0x19f   : > { %v2159_v4 = vmul.f32 1e+30, %v2155_v2 }
 0x1a0   : > { %772 = vperm.xlu1 %3309, %v759_v58   ;;  %v2153_v58 = vsub.f32 1.0, %v2149_v63 }
 0x20e   : > { %v788_v61 = vpop.permute.xlu1 %787 }
 0x20f   : > { %3039 = vmatprep.subr.mxu1 %v788_v61 }
 0x210   : > { %3040 = vmatpush3.msra.mxu1 %v788_v61  ;;  %v2157_v61 = vmul.f32 1e+30, %v2153_v58 }
 0x211   : > { %3042 = vmatmul.mubr.msk.f32.vlgmr.msra.gmra.mrb[2].mxu1 %vm790_vm4, %v2837_v5  ;;  %v2156_v5 = vsub.f32 1.0, %v2152_v3 }
 0x212   : > { %3044 = vmatprep.mubr.msk.f32.mxu1 %vm790_vm4, %v2838_v6 }
 0x21f   : > { %v773_v7 = vpop.permute.xlu1 %772 }
 0x220   : > { %vm777_vm8 = vcmp.eq.s32.totalorder %v773_v7, %v761_v45  ;;  %v1225_v7 = vld [vmem:[%s4000_s10 + $0x8] sm:$0xff] }
 0x221   : > { %v2839_v8 = vsel %vm777_vm8, 1.0, %v3405_v12 }
 0x222   : > { %3045 = vmatmul.mubr.msk.f32.gmra.mrb[4].mxu1 %vm790_vm4, %v2839_v8  ;;  %v1228_v8 = vld [vmem:[%s4000_s10 + $0x20] sm:$0xff] }
 0x223   : > { %1323 = vmatprep.mubr.f32.mxu1 %v3405_v12 }
 0x255   : > { %v3053_v10 = vpop.f32.mrb[0].mxu0 }
 0x256   : > { %v1119_v13 = vadd.f32 %v3053_v10, %v2850_v9  ;;  %v1113_v14 = vpop.f32.mrb[1].mxu0  ;;  %v1226_v10 = vld [vmem:[%s4000_s10 + $0x10] sm:$0xff] }
 0x257   : > { %v1114_v15 = vadd.f32 %v2850_v9, %v1113_v14  ;;  %v3193_v14 = vpack.c.bf16 %v1228_v8, %v1225_v7  ;;  %v1433_v7 = vld [vmem:[%s4003_s13] sm:$0xff]  ;;  %v1436_v8 = vld [vmem:[%s4003_s13 + $0x18] sm:$0xff] }
 0x258   : > { %v2856_v16 = vmul.f32 -1.442695, %v1119_v13 }
 0x259   : > { %v2855_v17 = vmul.f32 -1.442695, %v1114_v15  ;;  %3194 = vmatprep.subr.bf16.mxu1 %v3193_v14  ;;  %v1654_v14 = vld [vmem:[%s4004_s14 + $0x88] sm:$0xff] }
 0x25a   : > { %3338 = vpow2.f32 %v2856_v16 }
 0x25b   : > { %3340 = vpow2.f32 %v2855_v17 }
 0x25d   : > { %v3056_v18 = vpop.f32.mrb[2].mxu0 }
 0x25e   : > { %v1129_v19 = vadd.f32 %v3056_v18, %v2850_v9  ;;  %v1123_v20 = vpop.f32.mrb[3].mxu0  ;;  %v1227_v18 = vld [vmem:[%s4000_s10 + $0x18] sm:$0xff] }
 0x25f   : > { %v1124_v21 = vadd.f32 %v2850_v9, %v1123_v20  ;;  %v2160_v9 = vmul.f32 1e+30, %v2156_v5  ;;  %v1434_v20 = vld [vmem:[%s4003_s13 + $0x8] sm:$0xff] }
 0x260   : > { %v2858_v22 = vmul.f32 -1.442695, %v1129_v19 }
 0x261   : > { %v2857_v23 = vmul.f32 -1.442695, %v1124_v21 }
 0x262   : > { %3342 = vpow2.f32 %v2858_v22 }
 0x263   : > { %3344 = vpow2.f32 %v2857_v23  ;;  %v1435_v23 = vld [vmem:[%s4003_s13 + $0x10] sm:$0xff] }
 0x264   : > { %v3339_v24 = vpop.eup %3338 }
 0x265   : > { %v3341_v25 = vpop.eup %3340  ;;  %v1145_v26 = vadd.f32 1.0, %v3339_v24  ;;  %v1438_v24 = vld [vmem:[%s4003_s13 + $0x28] sm:$0xff] }
 0x266   : > { %v1144_v27 = vadd.f32 1.0, %v3341_v25  ;;  %v3698_v25 = vpack.c.bf16 %v1438_v24, %v1435_v23 }
 0x267   : > { %3346 = vrcp.f32 %v1145_v26 }
 0x268   : > { %3348 = vrcp.f32 %v1144_v27 }
 0x26c   : > { %v3343_v28 = vpop.eup %3342 }
 0x26d   : > { %v3345_v29 = vpop.eup %3344  ;;  %v1147_v30 = vadd.f32 1.0, %v3343_v28 }
 0x26e   : > { %v1146_v31 = vadd.f32 1.0, %v3345_v29 }
 0x26f   : > { %3350 = vrcp.f32 %v1147_v30 }
 0x270   : > { %3352 = vrcp.f32 %v1146_v31 }
 0x271   : > { %v3347_v32 = vpop.eup %3346  ;;  %3354 = vpow2.f32 %v2892_v46 }
 0x272   : > { %v3349_v33 = vpop.eup %3348  ;;  %v3630_v34 = vmul.f32 %v3347_v32, %v1119_v13  ;;  %v1229_v13 = vld [vmem:[%s4000_s10 + $0x28] sm:$0xff] }
 0x273   : > { %v3632_v35 = vmul.f32 %v3349_v33, %v1114_v15  ;;  %v1224_v15 = vld [vmem:[%s4000_s10] sm:$0xff]  ;;  %v3197_v17 = vpack.c.bf16 %v1229_v13, %v1226_v10 }
 0x274   : > { %v1163_v36 = vsel %vm658_vm0, %v3630_v34, 0.0  ;;  %v1173_v40 = vmul.f32 %v3630_v34, %v3630_v34 }
 0x275   : > { %1164 = vadd.xlane.f32.xlu1 %v1163_v36  ;;  %v1160_v39 = vsel %vm658_vm0, %v3632_v35, 0.0  ;;  %v1172_v43 = vmul.f32 %v3632_v35, %v3632_v35  ;;  %3198 = vmatprep.subr.bf16.mxu0 %v3197_v17 }
 0x276   : > { %1161 = vadd.xlane.f32.xlu0 %v1160_v39  ;;  %v1179_v42 = vsel %vm658_vm0, %v1173_v40, 0.0  ;;  %3200 = vmatpush3.bf16.msra.mxu0 %v3197_v17 }
 0x277   : > { %v1176_v49 = vsel %vm658_vm0, %v1172_v43, 0.0 }
 0x279   : > { %v3351_v41 = vpop.eup %3350 }
 0x27a   : > { %v3353_v44 = vpop.eup %3352  ;;  %1180 = vadd.xlane.f32.xlu0 %v1179_v42  ;;  %v3646_v47 = vmul.f32 %v3351_v41, %v1129_v19  ;;  %v3195_v19 = vpack.c.bf16 %v1227_v18, %v1224_v15  ;;  %v1669_v15 = vld [vmem:[%s4004_s14 + $0x100] sm:$0xff] }
 0x27b   : > { %v3643_v45 = vmul.f32 %v3353_v44, %v1124_v21  ;;  %v3355_v55 = vpop.eup %3354  ;;  %v1437_v21 = vld [vmem:[%s4003_s13 + $0x20] sm:$0xff] }
 0x27c   : > { %v1169_v52 = vsel %vm658_vm0, %v3646_v47, 0.0  ;;  %v1175_v53 = vmul.f32 %v3646_v47, %v3646_v47  ;;  %v2323_v59 = vadd.f32 1.0, %v3355_v55  ;;  %3196 = vmatpush1.bf16.msra.mxu1 %v3195_v19  ;;  %v3201_v22 = vpack.c.bf16 %v1437_v21, %v1434_v20 }
 0x27d   : > { %v1166_v48 = vsel %vm658_vm0, %v3643_v45, 0.0  ;;  %v1174_v50 = vmul.f32 %v3643_v45, %v3643_v45  ;;  %3206 = vmatprep.subr.bf16.mxu1 %v3698_v25  ;;  %v3203_v20 = vpack.c.bf16 %v1436_v8, %v1433_v7  ;;  %v1678_v7 = vld [vmem:[%s4004_s14 + $0x148] sm:$0xff]  ;;  %v1647_v8 = vld [vmem:[%s4004_s14 + $0x50] sm:$0xff] }
 0x27e   : > { %1167 = vadd.xlane.f32.xlu1 %v1166_v48  ;;  %1177 = vadd.xlane.f32.xlu0 %v1176_v49  ;;  %v1185_v54 = vsel %vm658_vm0, %v1175_v53, 0.0  ;;  %3356 = vrcp.f32 %v2323_v59 }
 0x27f   : > { %v1182_v51 = vsel %vm658_vm0, %v1174_v50, 0.0  ;;  %3202 = vmatprep.subr.bf16.mxu0 %v3201_v22 }
 0x282   : > { %1183 = vadd.xlane.f32.xlu1 %v1182_v51  ;;  %1170 = vadd.xlane.f32.xlu0 %v1169_v52 }
 0x286   : > { %1186 = vadd.xlane.f32.xlu0 %v1185_v54 }
 0x288   : > { %v3357_v6 = vpop.eup %3356 }
 0x289   : > { %v2326_v16 = vmul.f32 %v3357_v6, %v3615_v38 }
 0x293   : > { %2074 = vrot.lane.b32.xlu1 %v2072_v0, %s3407_s28 }
 0x297   : > { %2168 = vperm.xlu1 %3309, %v2158_v1  }
 0x29b   : > { %2173 = vperm.xlu1 %3309, %v2159_v4  }
 0x29c   : > { %2163 = vperm.xlu0 %3308, %v2157_v61  }
 0x29f   : > { %2328 = vrot.lane.b32.xlu1 %v2326_v16, %s3408_s29  ;;  %v1670_v16 = vld [vmem:[%s4004_s14 + $0x108] sm:$0xff]  ;;  %s3412_s29 = smov 64  }
 0x2a0   : > { %2178 = vperm.xlu0 %3308, %v2160_v9   ;;  %v1653_v9 = vld [vmem:[%s4004_s14 + $0x80] sm:$0xff] }
 0x2a1   : > { %v3209_v22 = vpack.c.bf16 %v1654_v14, %v1653_v9  ;;  %v1648_v9 = vld [vmem:[%s4004_s14 + $0x58] sm:$0xff]  ;;  %v1665_v14 = vld [vmem:[%s4004_s14 + $0xe0] sm:$0xff] }
 0x2e4   : > { %v3043_v26 = vpop.f32.mrb[2].mxu1 }
 0x2e5   : > { %v3702_v27 = vadd.f32 %v3043_v26, %v3615_v38  ;;  %v869_v28 = vpop.f32.mrb[3].mxu1 }
 0x2e6   : > { %v3705_v29 = vadd.f32 %v869_v28, %v3615_v38 }
 0x2f5   : > { %v3046_v30 = vpop.f32.mrb[4].mxu1 }
 0x2f6   : > { %v3708_v31 = vadd.f32 %v3046_v30, %v3615_v38  ;;  %v879_v32 = vpop.f32.mrb[5].mxu1  ;;  %v1637_v30 = vld [vmem:[%s4004_s14] sm:$0xff] }
 0x2f7   : > { %v3711_v33 = vadd.f32 %v879_v32, %v3615_v38  ;;  %v1656_v32 = vld [vmem:[%s4004_s14 + $0x98] sm:$0xff] }
 0x302   : > { %v1165_v36 = vpop.xlane.xlu1 %1164 }
 0x303   : > { %v1162_v39 = vpop.xlane.xlu0 %1161  ;;  %v1189_v40 = vmul.f32 0.0625, %v1165_v36 }
 0x304   : > { %v1188_v43 = vmul.f32 0.0625, %v1162_v39 }
 0x305   : > { %v1197_v42 = vmul.f32 %v1189_v40, %v1189_v40  ;;  %v1209_v18 = vsub.f32 %v3630_v34, %v1189_v40  ;;  %v1639_v40 = vld [vmem:[%s4004_s14 + $0x10] sm:$0xff] }
 0x306   : > { %v1196_v50 = vmul.f32 %v1188_v43, %v1188_v43  ;;  %v1208_v13 = vsub.f32 %v3632_v35, %v1188_v43  ;;  %v3241_v35 = vpack.c.bf16 %v1670_v16, %v1669_v15  ;;  %v1658_v43 = vld [vmem:[%s4004_s14 + $0xa8] sm:$0xff]  ;;  %v1679_v16 = vld [vmem:[%s4004_s14 + $0x150] sm:$0xff] }
 0x307   : > { %v1181_v41 = vpop.xlane.xlu0 %1180  ;;  %v1666_v15 = vld [vmem:[%s4004_s14 + $0xe8] sm:$0xff] }
 0x308   : > { %v1193_v44 = vmul.f32 0.0625, %v1181_v41  ;;  %v1640_v41 = vld [vmem:[%s4004_s14 + $0x18] sm:$0xff] }
 0x30a   : > { %v1201_v46 = vsub.f32 %v1193_v44, %v1197_v42  ;;  %v1657_v42 = vld [vmem:[%s4004_s14 + $0xa0] sm:$0xff]  ;;  %v1671_v44 = vld [vmem:[%s4004_s14 + $0x110] sm:$0xff] }
 0x30b   : > { %v1168_v48 = vpop.xlane.xlu1 %1167  ;;  %v1178_v49 = vpop.xlane.xlu0 %1177 }
 0x30c   : > { %v1205_v51 = vmax.f32 %v1201_v46, 0.0  ;;  %v1190_v52 = vmul.f32 0.0625, %v1168_v48  ;;  %v1192_v53 = vmul.f32 0.0625, %v1178_v49  ;;  %v1672_v46 = vld [vmem:[%s4004_s14 + $0x118] sm:$0xff]  ;;  %v3215_v48 = vpack.c.bf16 %v1640_v41, %v1639_v40  ;;  %v1230_v41 = vld [vmem:[%s4001_s11] sm:$0x7] }
 0x30d   : > { %v3217_v49 = vpack.c.bf16 %v1658_v43, %v1657_v42 }
 0x30e   : > { %v1200_v54 = vsub.f32 %v1192_v53, %v1196_v50  ;;  %v1213_v55 = vadd.f32 1e-05, %v1205_v51  ;;  %v1198_v38 = vmul.f32 %v1190_v52, %v1190_v52  ;;  %v1210_v23 = vsub.f32 %v3643_v45, %v1190_v52  ;;  %v1641_v51 = vld [vmem:[%s4004_s14 + $0x20] sm:$0xff]  ;;  %v1642_v52 = vld [vmem:[%s4004_s14 + $0x28] sm:$0xff]  ;;  %v1659_v53 = vld [vmem:[%s4004_s14 + $0xb0] sm:$0xff] }
 0x30f   : > { %v1184_v56 = vpop.xlane.xlu1 %1183  ;;  %v1171_v59 = vpop.xlane.xlu0 %1170  ;;  %v3245_v50 = vpack.c.bf16 %v1672_v46, %v1671_v44 }
 0x310   : > { %v1204_v60 = vmax.f32 %v1200_v54, 0.0  ;;  %v1194_v57 = vmul.f32 0.0625, %v1184_v56  ;;  %v1191_v62 = vmul.f32 0.0625, %v1171_v59  ;;  %3358 = vrsqrt.f32 %v1213_v55  ;;  %v1673_v54 = vld [vmem:[%s4004_s14 + $0x120] sm:$0xff]  ;;  %v1674_v55 = vld [vmem:[%s4004_s14 + $0x128] sm:$0xff] }
 0x311   : > { %v3249_v59 = vpack.c.bf16 %v1674_v55, %v1673_v54 }
 0x312   : > { %v1212_v63 = vadd.f32 1e-05, %v1204_v60  ;;  %v1202_v0 = vsub.f32 %v1194_v57, %v1198_v38  ;;  %v1199_v58 = vmul.f32 %v1191_v62, %v1191_v62  ;;  %v1211_v34 = vsub.f32 %v3646_v47, %v1191_v62  ;;  %v1655_v47 = vld [vmem:[%s4004_s14 + $0x90] sm:$0xff]  ;;  %v1644_v60 = vld [vmem:[%s4004_s14 + $0x38] sm:$0xff]  ;;  %v1661_v62 = vld [vmem:[%s4004_s14 + $0xc0] sm:$0xff] }
 0x313   : > { %v1187_v1 = vpop.xlane.xlu0 %1186  ;;  %v3213_v39 = vpack.c.bf16 %v1656_v32, %v1655_v47  ;;  %v1643_v38 = vld [vmem:[%s4004_s14 + $0x30] sm:$0xff]  ;;  %v1684_v32 = vld [vmem:[%s4004_s14 + $0x178] sm:$0xff] }
 0x314   : > { %3360 = vrsqrt.f32 %v1212_v63  ;;  %v1206_v2 = vmax.f32 %v1202_v0, 0.0  ;;  %v1195_v3 = vmul.f32 0.0625, %v1187_v1  ;;  %v3223_v57 = vpack.c.bf16 %v1644_v60, %v1643_v38  ;;  %v1675_v63 = vld [vmem:[%s4004_s14 + $0x130] sm:$0xff]  ;;  %v1676_v1 = vld [vmem:[%s4004_s14 + $0x138] sm:$0xff] }
 0x315   : > { %v1683_v47 = vld [vmem:[%s4004_s14 + $0x170] sm:$0xff] }
 0x316   : > { %v1214_v4 = vadd.f32 1e-05, %v1206_v2  ;;  %v1203_v61 = vsub.f32 %v1195_v3, %v1199_v58  ;;  %v1646_v2 = vld [vmem:[%s4004_s14 + $0x48] sm:$0xff]  ;;  %v3253_v58 = vpack.c.bf16 %v1676_v1, %v1675_v63 }
 0x318   : > { %3362 = vrsqrt.f32 %v1214_v4  ;;  %v1207_v5 = vmax.f32 %v1203_v61, 0.0  ;;  %v1663_v4 = vld [vmem:[%s4004_s14 + $0xd0] sm:$0xff]  ;;  %v1664_v61 = vld [vmem:[%s4004_s14 + $0xd8] sm:$0xff] }
 0x31a   : > { %v1215_v6 = vadd.f32 1e-05, %v1207_v5  ;;  %v3359_v10 = vpop.eup %3358  ;;  %v1677_v5 = vld [vmem:[%s4004_s14 + $0x140] sm:$0xff] }
 0x31b   : > { %v1221_v21 = vmul.f32 %v3359_v10, %v1209_v18  ;;  %v3257_v10 = vpack.c.bf16 %v1678_v7, %v1677_v5  ;;  %v1680_v18 = vld [vmem:[%s4004_s14 + $0x158] sm:$0xff] }
 0x31c   : > { %3364 = vrsqrt.f32 %v1215_v6  ;;  %v3229_v6 = vpack.c.bf16 %v1664_v61, %v1663_v4 }
 0x31e   : > { %v3361_v17 = vpop.eup %3360 }
 0x31f   : > { %v1220_v19 = vmul.f32 %v3361_v17, %v1208_v13  ;;  %v3231_v13 = vpack.c.bf16 %v1648_v9, %v1647_v8  ;;  %v3233_v17 = vpack.c.bf16 %v1666_v15, %v1665_v14 }
 0x321   : > { %2859 = vmatmul.mubr.msk.f32.vlgmr.msra.gmra.mrb[6].mxu1 %vm658_vm0, %v1220_v19  ;;  %3061 = vmatprep.mubr.msk.f32.mxu0 %vm658_vm0, %v1220_v19  ;;  %v1649_v19 = vld [vmem:[%s4004_s14 + $0x60] sm:$0xff] }
 0x322   : > { %v3363_v24 = vpop.eup %3362  ;;  %3062 = vmatmul.mubr.msk.f32.vlgmr.msra.gmra.mrb[4].mxu0 %vm658_vm0, %v1221_v21  ;;  %1329 = vmatprep.mubr.f32.mxu1 %v3405_v12 }
 0x323   : > { %v1222_v26 = vmul.f32 %v3363_v24, %v1210_v23  ;;  %3204 = vmatpush1.bf16.msra.mxu0 %v3203_v20  ;;  %3208 = vmatpush3.bf16.msra.mxu1 %v3698_v25  ;;  %v1638_v25 = vld [vmem:[%s4004_s14 + $0x8] sm:$0xff]  ;;  %v1668_v23 = vld [vmem:[%s4004_s14 + $0xf8] sm:$0xff]  ;;  %v1681_v24 = vld [vmem:[%s4004_s14 + $0x160] sm:$0xff] }
 0x324   : > { %3210 = vmatprep.subr.bf16.mxu0 %v3209_v22  ;;  %3242 = vmatprep.subr.bf16.mxu1 %v3241_v35  ;;  %v3211_v36 = vpack.c.bf16 %v1638_v25, %v1637_v30  ;;  %v1650_v20 = vld [vmem:[%s4004_s14 + $0x68] sm:$0xff] }
 0x325   : > { %2860 = vmatmul.mubr.msk.f32.gmra.mrb[8].mxu1 %vm658_vm0, %v1221_v21  ;;  %3064 = vmatprep.mubr.msk.f32.mxu0 %vm658_vm0, %v1222_v26  ;;  %v3261_v21 = vpack.c.bf16 %v1680_v18, %v1679_v16  ;;  %v3235_v22 = vpack.c.bf16 %v1650_v20, %v1649_v19 }
 0x326   : > { %v3365_v45 = vpop.eup %3364  ;;  %1335 = vmatprep.mubr.f32.mxu1 %v3405_v12 }
 0x327   : > { %v1223_v28 = vmul.f32 %v3365_v45, %v1211_v34  ;;  %v1682_v34 = vld [vmem:[%s4004_s14 + $0x168] sm:$0xff]  ;;  %v1651_v45 = vld [vmem:[%s4004_s14 + $0x70] sm:$0xff] }
 0x328   : > { %v3265_v30 = vpack.c.bf16 %v1682_v34, %v1681_v24 }
 0x329   : > { %2861 = vmatmul.mubr.msk.f32.gmra.mrb[10].mxu1 %vm658_vm0, %v1222_v26  ;;  %3065 = vmatmul.mubr.msk.f32.gmra.mrb[6].mxu0 %vm658_vm0, %v1223_v28 }
 0x32a   : > { %1341 = vmatprep.mubr.f32.mxu1 %v3405_v12  ;;  %1515 = vmatprep.mubr.f32.mxu0 %v3405_v12 }
 0x32d   : > { %2862 = vmatmul.mubr.msk.f32.gmra.mrb[12].mxu1 %vm658_vm0, %v1223_v28  ;;  %2867 = vmatmul.mubr.msk.f32.vlgmr.msra.gmra.mrb[8].mxu0 %vm658_vm0, %v3705_v29  ;;  %v1652_v28 = vld [vmem:[%s4004_s14 + $0x78] sm:$0xff] }
 0x32e   : > { %3071 = vmatprep.mubr.msk.f32.mxu1 %vm658_vm0, %v3705_v29  ;;  %1521 = vmatprep.mubr.f32.mxu0 %v3405_v12  ;;  %v1660_v29 = vld [vmem:[%s4004_s14 + $0xb8] sm:$0xff]  ;;  %v3239_v25 = vpack.c.bf16 %v1652_v28, %v1651_v45  ;;  %v1855_v28 = vld [vmem:[%s4002_s12] sm:$0xff] }
 0x32f   : > { %3212 = vmatpush3.bf16.msra.mxu0 %v3211_v36  ;;  %v3221_v56 = vpack.c.bf16 %v1660_v29, %v1659_v53  ;;  %v3269_v36 = vpack.c.bf16 %v1684_v32, %v1683_v47  ;;  %v1857_v47 = vld [vmem:[%s4002_s12 + $0x10] sm:$0xff]  ;;  %v1968_v32 = vld [vmem:[%s4006_s16] sm:$0xff] }
 0x330   : > { %3214 = vmatprep.subr.bf16.mxu0 %v3213_v39  ;;  %v1233_v39 = vshrl.u32 %v760_v37, 7 }
 0x331   : > { %2868 = vmatmul.mubr.msk.f32.gmra.mrb[10].mxu0 %vm658_vm0, %v3702_v27  ;;  %3072 = vmatmul.mubr.msk.f32.vlgmr.msra.gmra.mrb[14].mxu1 %vm658_vm0, %v3702_v27  ;;  %v3219_v27 = vpack.c.bf16 %v1642_v52, %v1641_v51 }
 0x332   : > { %3074 = vmatprep.mubr.msk.f32.mxu1 %vm658_vm0, %v3711_v33  ;;  %1527 = vmatprep.mubr.f32.mxu0 %v3405_v12  ;;  %v1234_v40 = vsub.s32 0, %v1233_v39  ;;  %v1238_v42 = vsub.s32 1, %v1233_v39  ;;  %v1242_v43 = vsub.s32 2, %v1233_v39 }
 0x333   : > { %3216 = vmatpush3.bf16.msra.mxu0 %v3215_v48  ;;  %3244 = vmatpush3.bf16.msra.mxu1 %v3241_v35  ;;  %v1667_v35 = vld [vmem:[%s4004_s14 + $0xf0] sm:$0xff] }
 0x334   : > { %3218 = vmatprep.subr.bf16.mxu0 %v3217_v49  ;;  %3246 = vmatprep.subr.bf16.mxu1 %v3245_v50  ;;  %v3237_v26 = vpack.c.bf16 %v1668_v23, %v1667_v35  ;;  %v1235_v44 = vrot.slane %v1230_v41, %v1234_v40  ;;  %v1239_v46 = vrot.slane %v1230_v41, %v1238_v42 }
 0x335   : > { %2869 = vmatmul.mubr.msk.f32.gmra.mrb[12].mxu0 %vm658_vm0, %v3711_v33  ;;  %3075 = vmatmul.mubr.msk.f32.gmra.mrb[16].mxu1 %vm658_vm0, %v3708_v31  ;;  %v1662_v33 = vld [vmem:[%s4004_s14 + $0xc8] sm:$0xff]  ;;  %v1243_v48 = vrot.slane %v1230_v41, %v1242_v43 }
 0x336   : > { %1533 = vmatprep.mubr.f32.mxu0 %v3405_v12  ;;  %v3225_v0 = vpack.c.bf16 %v1662_v33, %v1661_v62 }
 0x337   : > { %3220 = vmatpush3.bf16.msra.mxu0 %v3219_v27  ;;  %3248 = vmatpush3.bf16.msra.mxu1 %v3245_v50 }
 0x338   : > { %3222 = vmatprep.subr.bf16.mxu0 %v3221_v56  ;;  %3250 = vmatprep.subr.bf16.mxu1 %v3249_v59 }
 0x339   : > { %2870 = vmatmul.mubr.msk.f32.gmra.mrb[14].mxu0 %vm658_vm0, %v3708_v31  ;;  %v1645_v31 = vld [vmem:[%s4004_s14 + $0x40] sm:$0xff] }
 0x33a   : > { %v3227_v3 = vpack.c.bf16 %v1646_v2, %v1645_v31 }
 0x33b   : > { %3224 = vmatpush3.bf16.msra.mxu0 %v3223_v57  ;;  %3252 = vmatpush3.bf16.msra.mxu1 %v3249_v59 }
 0x33c   : > { %3226 = vmatprep.subr.bf16.mxu0 %v3225_v0  ;;  %3254 = vmatprep.subr.bf16.mxu1 %v3253_v58 }
 0x33f   : > { %3228 = vmatpush3.bf16.msra.mxu0 %v3227_v3  ;;  %3256 = vmatpush3.bf16.msra.mxu1 %v3253_v58 }
 0x340   : > { %3230 = vmatprep.subr.bf16.mxu0 %v3229_v6  ;;  %3258 = vmatprep.subr.bf16.mxu1 %v3257_v10 }
 0x343   : > { %3232 = vmatpush3.bf16.msra.mxu0 %v3231_v13  ;;  %3260 = vmatpush3.bf16.msra.mxu1 %v3257_v10 }
 0x344   : > { %3234 = vmatprep.subr.bf16.mxu0 %v3233_v17  ;;  %3262 = vmatprep.subr.bf16.mxu1 %v3261_v21 }
 0x347   : > { %3236 = vmatpush3.bf16.msra.mxu0 %v3235_v22  ;;  %3264 = vmatpush3.bf16.msra.mxu1 %v3261_v21 }
 0x348   : > { %3238 = vmatprep.subr.bf16.mxu0 %v3237_v26  ;;  %3266 = vmatprep.subr.bf16.mxu1 %v3265_v30 }
 0x34b   : > { %3240 = vmatpush3.bf16.msra.mxu0 %v3239_v25  ;;  %3268 = vmatpush3.bf16.msra.mxu1 %v3265_v30  ;;  %v1856_v30 = vld [vmem:[%s4002_s12 + $0x8] sm:$0xff] }
 0x34c   : > { %3270 = vmatprep.subr.bf16.mxu1 %v3269_v36  ;;  %v3273_v25 = vpack.c.bf16 %v1856_v30, %v1855_v28  ;;  %3127 = vmatprep.subr.mxu0 %v1968_v32 }
 0x34f   : > { %3272 = vmatpush3.bf16.msra.mxu1 %v3269_v36 }
 0x350   : > { %3274 = vmatprep.subr.bf16.mxu1 %v3273_v25 }
 0x3f4   : > { %v1325_v49 = vpop.f32.mrb[6].mxu1 }
 0x3f5   : > { %v1326_v50 = vadd.f32 %v1325_v49, %v1235_v44  ;;  %v1327_v51 = vpop.f32.mrb[7].mxu1  ;;  %v3063_v52 = vpop.f32.mrb[4].mxu0 }
 0x3f6   : > { %v1328_v53 = vadd.f32 %v1327_v51, %v1239_v46  ;;  %v1420_v29 = vadd.f32 %v3063_v52, %v1243_v48  ;;  %v1414_v54 = vpop.f32.mrb[5].mxu0 }
 0x3f7   : > { %v1415_v55 = vadd.f32 %v1414_v54, %v1243_v48 }
 0x3f8   : > { %v1331_v27 = vpop.f32.mrb[8].mxu1 }
 0x3f9   : > { %v1332_v37 = vadd.f32 %v1331_v27, %v1235_v44  ;;  %v1333_v56 = vpop.f32.mrb[9].mxu1 }
 0x3fa   : > { %v1334_v59 = vadd.f32 %v1333_v56, %v1239_v46 }
 0x3fc   : > { %v1337_v38 = vpop.f32.mrb[10].mxu1  ;;  %v3066_v60 = vpop.f32.mrb[6].mxu0 }
 0x3fd   : > { %v1338_v57 = vadd.f32 %v1337_v38, %v1235_v44  ;;  %v1430_v62 = vadd.f32 %v3066_v60, %v1243_v48  ;;  %v1339_v33 = vpop.f32.mrb[11].mxu1  ;;  %v1424_v63 = vpop.f32.mrb[7].mxu0  ;;  %v2213_v38 = vld [vmem:[%s4007_s17] sm:$0xff]  ;;  %v2214_v60 = vld [vmem:[%s4007_s17 + $0x8] sm:$0xff] }
 0x3fe   : > { %v1340_v0 = vadd.f32 %v1339_v33, %v1239_v46  ;;  %v1425_v1 = vadd.f32 %v1424_v63, %v1243_v48 }
 0x400   : > { %v1343_v31 = vpop.f32.mrb[12].mxu1  ;;  %v1517_v2 = vpop.f32.mrb[8].mxu0 }
 0x401   : > { %v1344_v58 = vadd.f32 %v1343_v31, %v1235_v44  ;;  %v1625_v3 = vmul.f32 %v1517_v2, %v1326_v50  ;;  %v1345_v4 = vpop.f32.mrb[13].mxu1  ;;  %v1519_v61 = vpop.f32.mrb[9].mxu0 }
 0x402   : > { %v1346_v5 = vadd.f32 %v1345_v4, %v1239_v46  ;;  %v1626_v6 = vmul.f32 %v1519_v61, %v1328_v53 }
 0x404   : > { %v1523_v7 = vpop.f32.mrb[10].mxu0  ;;  %v3073_v8 = vpop.f32.mrb[14].mxu1  ;;  %1749 = vmatprep.mubr.f32.mxu0 %v1626_v6 }
 0x405   : > { %v1628_v9 = vmul.f32 %v1523_v7, %v1332_v37  ;;  %v1630_v10 = vmul.f32 %v3073_v8, %v1420_v29  ;;  %v1525_v13 = vpop.f32.mrb[11].mxu0  ;;  %v1606_v14 = vpop.f32.mrb[15].mxu1  ;;  %1750 = vmatmul.mubr.f32.vlgmr.msra.gmra.mrb[16].mxu0 %v1625_v3 }
 0x406   : > { %v1629_v15 = vmul.f32 %v1525_v13, %v1334_v59  ;;  %v1627_v16 = vmul.f32 %v1606_v14, %v1415_v55  ;;  %3128 = vmatpush3.msra.mxu0 %v1968_v32  ;;  %v2075_v59 = vpop.permute.xlu1 %2074 }
 0x407   : > { %3281 = vmatprep.subr.bf16.mxu0 %v3403_v11 }
 0x408   : > { %v1529_v17 = vpop.f32.mrb[12].mxu0  ;;  %v3076_v18 = vpop.f32.mrb[16].mxu1  ;;  %1754 = vmatprep.mubr.f32.mxu0 %v1629_v15  ;;  %3109 = vmatprep.mubr.f32.mxu1 %v1627_v16 }
 0x409   : > { %v1631_v19 = vmul.f32 %v1529_v17, %v1338_v57  ;;  %v1636_v20 = vmul.f32 %v3076_v18, %v1430_v62  ;;  %v1531_v21 = vpop.f32.mrb[13].mxu0  ;;  %v1616_v22 = vpop.f32.mrb[17].mxu1  ;;  %1755 = vmatmul.mubr.f32.gmra.mrb[18].mxu0 %v1628_v9  ;;  %3110 = vmatmul.mubr.f32.vlgmr.msra.gmra.mrb[18].mxu1 %v1630_v10  ;;  %v3277_v57 = vpack.c.bf16 %v2214_v60, %v2213_v38 }
 0x40a   : > { %v1632_v35 = vmul.f32 %v1531_v21, %v1340_v0  ;;  %v1633_v23 = vmul.f32 %v1616_v22, %v1425_v1  ;;  %3276 = vmatpush3.bf16.msra.mxu1 %v3273_v25 }
 0x40b   : > { %3119 = vmatprep.subr.mxu1 %v1857_v47 }
 0x40c   : > { %v1535_v24 = vpop.f32.mrb[14].mxu0  ;;  %1759 = vmatprep.mubr.f32.mxu0 %v1632_v35  ;;  %3112 = vmatprep.mubr.f32.mxu1 %v1633_v23 }
 0x40d   : > { %v1634_v26 = vmul.f32 %v1535_v24, %v1344_v58  ;;  %v1537_v34 = vpop.f32.mrb[15].mxu0  ;;  %1760 = vmatmul.mubr.f32.gmra.mrb[20].mxu0 %v1631_v19  ;;  %3113 = vmatmul.mubr.f32.gmra.mrb[20].mxu1 %v1636_v20  ;;  %v3931_v58 = vpop.permute.xlu1 %2168 }
 0x40e   : > { %v1635_v45 = vmul.f32 %v1537_v34, %v1346_v5  ;;  %3120 = vmatpush3.msra.mxu1 %v1857_v47 }
 0x40f   : > { %3135 = vmatprep.subr.mxu1 %v3405_v12 }
 0x410   : > { %1764 = vmatprep.mubr.f32.mxu0 %v1635_v45 }
 0x411   : > { %1765 = vmatmul.mubr.f32.gmra.mrb[22].mxu0 %v1634_v26  ;;  %v3936_v9 = vpop.permute.xlu1 %2173 }
 0x415   : > { %v2329_v20 = vpop.permute.xlu1 %2328 }
 0x4d8   : > { %v2966_v36 = vpop.f32.mrb[16].mxu0 }
 0x4d9   : > { %v2967_v39 = vpop.f32.mrb[17].mxu0 }
 0x4da   : > { %v2968_v40 = vadd.f32 %v2967_v39, %v2966_v36  ;;  %v2164_v36 = vpop.permute.xlu0 %2163 }
 0x4dc   : > { %v2969_v41 = vpop.f32.mrb[18].mxu0  ;;  %v3111_v42 = vpop.f32.mrb[18].mxu1 }
 0x4dd   : > { %v2970_v43 = vpop.f32.mrb[19].mxu0  ;;  %v1836_v44 = vpop.f32.mrb[19].mxu1 }
 0x4de   : > { %v2971_v46 = vadd.f32 %v2970_v43, %v2969_v41  ;;  %v1837_v48 = vadd.f32 %v2968_v40, %v1836_v44  ;;  %v2179_v39 = vpop.permute.xlu0 %2178 }
 0x4e0   : > { %v1842_v49 = vadd.f32 %v3111_v42, %v2971_v46  ;;  %v2972_v50 = vpop.f32.mrb[20].mxu0  ;;  %v3114_v51 = vpop.f32.mrb[20].mxu1  ;;  %3121 = vmatprep.mubr.msk.f32.mxu1 %vm1858_vm10, %v1837_v48 }
 0x4e1   : > { %v2973_v52 = vpop.f32.mrb[21].mxu0  ;;  %v1846_v53 = vpop.f32.mrb[21].mxu1 }
 0x4e2   : > { %v2974_v29 = vadd.f32 %v2973_v52, %v2972_v50  ;;  %3122 = vmatmul.mubr.msk.f32.vlgmr.msra.gmra.mrb[22].mxu1 %vm1858_vm10, %v1842_v49 }
 0x4e3   : > { %3136 = vmatpush3.msra.mxu1 %v1968_v32  ;;  %v2427_v32 = vld [vmem:[%s4005_s15] sm:$0x3] }
 0x4e4   : > { %v1847_v54 = vadd.f32 %v2974_v29, %v1846_v53  ;;  %v2975_v55 = vpop.f32.mrb[22].mxu0  ;;  %3278 = vmatprep.subr.bf16.mxu1 %v3277_v57 }
 0x4e5   : > { %v2976_v27 = vpop.f32.mrb[23].mxu0 }
 0x4e6   : > { %v2977_v37 = vadd.f32 %v2976_v27, %v2975_v55  ;;  %3124 = vmatprep.mubr.msk.f32.mxu1 %vm1858_vm10, %v1847_v54 }
 0x4e8   : > { %v1852_v56 = vadd.f32 %v3114_v51, %v2977_v37 }
 0x4ea   : > { %3125 = vmatmul.mubr.msk.f32.gmra.mrb[24].mxu1 %vm1858_vm10, %v1852_v56 }
 0x4eb   : > { %3137 = vmatprep.mubr.msk.f32.mxu1 %vm3404_vm1, %v3405_v12 }
 0x4ee   : > { %3138 = vmatmul.mubr.msk.f32.vlgmr.msra.gmra.mrb[26].mxu1 %vm790_vm4, %v2075_v59 }
 0x4ef   : > { %3280 = vmatpush3.bf16.msra.mxu1 %v3277_v57 }
 0x4f0   : > { %3174 = vmatprep.subr.mxu1 %v3405_v12 }
 0x5b5   : > { %v3123_v62 = vpop.f32.mrb[22].mxu1 }
 0x5b6   : > { %v1961_v33 = vmul.f32 0.1, %v3123_v62  ;;  %v2885_v63 = vmul.f32 -1.442695, %v3123_v62  ;;  %v1937_v0 = vpop.f32.mrb[23].mxu1  ;;  %vm1957_vm11 = vcmp.ge.f32.partialorder %v3123_v62, 0.0 }
 0x5b7   : > { %v2884_v1 = vmul.f32 -1.442695, %v1937_v0  ;;  %vm1956_vm12 = vcmp.ge.f32.partialorder %v1937_v0, 0.0  ;;  %v1960_v31 = vmul.f32 0.1, %v1937_v0 }
 0x5b8   : > { %3366 = vpow2.f32 %v2885_v63  ;;  %v1965_v3 = vsel %vm1957_vm11, %v3123_v62, %v1961_v33 }
 0x5b9   : > { %3368 = vpow2.f32 %v2884_v1  ;;  %v1964_v2 = vsel %vm1956_vm12, %v1937_v0, %v1960_v31 }
 0x5ba   : > { %3129 = vmatprep.mubr.msk.f32.mxu0 %vm790_vm4, %v1964_v2 }
 0x5bb   : > { %3130 = vmatmul.mubr.msk.f32.vlgmr.msra.gmra.mrb[24].mxu0 %vm790_vm4, %v1965_v3 }
 0x5bc   : > { %3283 = vmatpush3.bf16.msra.mxu0 %v3277_v57 }
 0x5bd   : > { %v3126_v4 = vpop.f32.mrb[24].mxu1  ;;  %3157 = vmatprep.subr.mxu0 %v3405_v12 }
 0x5be   : > { %v2887_v61 = vmul.f32 -1.442695, %v3126_v4  ;;  %v1947_v5 = vpop.f32.mrb[25].mxu1  ;;  %v1963_v6 = vmul.f32 0.1, %v3126_v4  ;;  %vm1959_vm14 = vcmp.ge.f32.partialorder %v3126_v4, 0.0 }
 0x5bf   : > { %v2886_v7 = vmul.f32 -1.442695, %v1947_v5  ;;  %vm1958_vm13 = vcmp.ge.f32.partialorder %v1947_v5, 0.0  ;;  %v1962_v8 = vmul.f32 0.1, %v1947_v5 }
 0x5c0   : > { %3370 = vpow2.f32 %v2887_v61  ;;  %v1967_v16 = vsel %vm1959_vm14, %v3126_v4, %v1963_v6 }
 0x5c1   : > { %3372 = vpow2.f32 %v2886_v7  ;;  %v2144_v10 = vpop.f32.mrb[26].mxu1  ;;  %v1966_v13 = vsel %vm1958_vm13, %v1947_v5, %v1962_v8 }
 0x5c2   : > { %v3367_v14 = vpop.eup %3366  ;;  %3132 = vmatprep.mubr.msk.f32.mxu0 %vm790_vm4, %v1966_v13  ;;  %v3139_v15 = vpop.f32.mrb[27].mxu1  ;;  %v2148_v50 = vmul.f32 0.35355338, %v2144_v10 }
 0x5c3   : > { %v3369_v17 = vpop.eup %3368  ;;  %v2198_v18 = vadd.f32 1.0, %v3367_v14  ;;  %3133 = vmatmul.mubr.msk.f32.gmra.mrb[26].mxu0 %vm790_vm4, %v1967_v16  ;;  %v2621_v16 = vld [vmem:[%s4008_s18] sm:$0xff]  ;;  %vm2730_vm4 = vcmask 523264  }
 0x5c4   : > { %v2197_v19 = vadd.f32 1.0, %v3369_v17  ;;  %3154 = vmatprep.mubr.msk.f32.mxu0 %vm3404_vm1, %v3405_v12  ;;  %v2622_v17 = vld [vmem:[%s4008_s18 + $0x8] sm:$0xff] }
 0x5c5   : > { %3374 = vrcp.f32 %v2198_v18  ;;  %v3285_v18 = vpack.c.bf16 %v2622_v17, %v2621_v16 }
 0x5c6   : > { %3376 = vrcp.f32 %v2197_v19 }
 0x5c7   : > { %3155 = vmatmul.mubr.msk.f32.vlgmr.msra.gmra.mrb[28].mxu0 %vm658_vm0, %v2329_v20 }
 0x5c8   : > { %3159 = vmatprep.mubr.msk.f32.mxu0 %vm3404_vm1, %v3405_v12  ;;  %3158 = vmatpush3.msk.msra.mxu0 %vm2444_vm15, %v2427_v32 }
 0x5ca   : > { %v3371_v21 = vpop.eup %3370 }
 0x5cb   : > { %v3373_v22 = vpop.eup %3372  ;;  %v2200_v35 = vadd.f32 1.0, %v3371_v21 }
 0x5cc   : > { %v2199_v23 = vadd.f32 1.0, %v3373_v22 }
 0x5cd   : > { %3378 = vrcp.f32 %v2200_v35 }
 0x5ce   : > { %3380 = vrcp.f32 %v2199_v23 }
 0x5cf   : > { %v3375_v24 = vpop.eup %3374 }
 0x5d0   : > { %v3377_v26 = vpop.eup %3376  ;;  %v2210_v34 = vmul.f32 %v3375_v24, %v3123_v62 }
 0x5d1   : > { %v2209_v45 = vmul.f32 %v3377_v26, %v1937_v0 }
 0x5d2   : > { %2221 = vrot.lane.b32.xlu1 %v2210_v34, %s3409_s1 }
 0x5d3   : > { %2219 = vrot.lane.b32.xlu0 %v2209_v45, %s3409_s1 }
 0x5d7   : > { %v3379_v28 = vpop.eup %3378 }
 0x5d8   : > { %v3381_v30 = vpop.eup %3380  ;;  %v2212_v25 = vmul.f32 %v3379_v28, %v3126_v4 }
 0x5d9   : > { %v2211_v47 = vmul.f32 %v3381_v30, %v1947_v5 }
 0x5da   : > { %2225 = vrot.lane.b32.xlu1 %v2212_v25, %s3409_s1 }
 0x5db   : > { %2223 = vrot.lane.b32.xlu0 %v2211_v47, %s3409_s1  ;;  %s3414_s1 = smov 80  }
 0x644   : > { %v2222_v41 = vpop.permute.xlu1 %2221 }
 0x645   : > { %v2220_v40 = vpop.permute.xlu0 %2219 }
 0x646   : > { %3144 = vmatprep.mubr.msk.f32.mxu1 %vm658_vm0, %v2220_v40 }
 0x647   : > { %3145 = vmatmul.mubr.msk.f32.vlgmr.msra.gmra.mrb[28].mxu1 %vm658_vm0, %v2222_v41 }
 0x648   : > { %3175 = vmatpush3.msk.msra.mxu1 %vm2444_vm15, %v2427_v32 }
 0x649   : > { %3284 = vmatprep.subr.bf16.mxu1 %v3403_v11 }
 0x64c   : > { %v2226_v43 = vpop.permute.xlu1 %2225 }
 0x64d   : > { %v2224_v42 = vpop.permute.xlu0 %2223 }
 0x64e   : > { %3147 = vmatprep.mubr.msk.f32.mxu1 %vm658_vm0, %v2224_v42 }
 0x64f   : > { %3148 = vmatmul.mubr.msk.f32.gmra.mrb[30].mxu1 %vm658_vm0, %v2226_v43 }
 0x650   : > { %3176 = vmatprep.mubr.msk.f32.mxu1 %vm3404_vm1, %v3405_v12 }
 0x68e   : > { %v3131_v44 = vpop.f32.mrb[24].mxu0 }
 0x68f   : > { %v2047_v46 = vpop.f32.mrb[25].mxu0  ;;  %v2067_v48 = vmul.f32 0.35355338, %v3131_v44 }
 0x690   : > { %v2066_v49 = vmul.f32 0.35355338, %v2047_v46 }
 0x691   : > { %v2182_v52 = vsub.f32 %v2067_v48, %v3931_v58 }
 0x692   : > { %v2181_v51 = vsub.f32 %v2066_v49, %v2164_v36 }
 0x694   : > { %v2402_v53 = vmax.f32 %v2148_v50, %v2181_v51 }
 0x696   : > { %v3134_v29 = vpop.f32.mrb[26].mxu0  ;;  %v2403_v11 = vmax.f32 %v2402_v53, %v2182_v52 }
 0x697   : > { %v2057_v54 = vpop.f32.mrb[27].mxu0  ;;  %v2069_v55 = vmul.f32 0.35355338, %v3134_v29 }
 0x698   : > { %v2068_v27 = vmul.f32 0.35355338, %v2057_v54 }
 0x699   : > { %v2184_v38 = vsub.f32 %v2069_v55, %v2179_v39 }
 0x69a   : > { %v2183_v37 = vsub.f32 %v2068_v27, %v3936_v9  ;;  %v2398_v56 = vpop.f32.mrb[28].mxu0 }
 0x69b   : > { %v3156_v59 = vpop.f32.mrb[29].mxu0 }
 0x69c   : > { %v2404_v60 = vmax.f32 %v2403_v11, %v2183_v37 }
 0x69e   : > { %v2405_v57 = vmax.f32 %v2404_v60, %v2184_v38 }
 0x6a0   : > { %v2406_v62 = vsub.f32 %v2148_v50, %v2405_v57  ;;  %v2409_v33 = vsub.f32 %v2181_v51, %v2405_v57  ;;  %v2412_v63 = vsub.f32 %v2182_v52, %v2405_v57  ;;  %v2415_v0 = vsub.f32 %v2183_v37, %v2405_v57 }
 0x6a1   : > { %v2418_v1 = vsub.f32 %v2184_v38, %v2405_v57 }
 0x6a2   : > { %v2407_v31 = vmul.f32 1.442695, %v2406_v62  ;;  %v2410_v2 = vmul.f32 1.442695, %v2409_v33  ;;  %v2413_v58 = vmul.f32 1.442695, %v2412_v63 }
 0x6a3   : > { %v2416_v3 = vmul.f32 1.442695, %v2415_v0  ;;  %v2419_v4 = vmul.f32 1.442695, %v2418_v1 }
 0x6a4   : > { %3382 = vpow2.f32 %v2407_v31 }
 0x6a5   : > { %3384 = vpow2.f32 %v2410_v2 }
 0x6a6   : > { %3386 = vpow2.f32 %v2413_v58 }
 0x6a7   : > { %3388 = vpow2.f32 %v2416_v3 }
 0x6a8   : > { %3390 = vpow2.f32 %v2419_v4 }
 0x6ae   : > { %v3383_v61 = vpop.eup %3382 }
 0x6af   : > { %v3385_v5 = vpop.eup %3384  ;;  %3160 = vmatmul.mubr.msk.f32.vlgmr.msra.gmra.mrb[30].mxu0 %vm2428_vm2, %v3383_v61 }
 0x6b0   : > { %v2421_v6 = vadd.f32 %v3385_v5, %v3383_v61  ;;  %3162 = vmatprep.mubr.msk.f32.mxu0 %vm3404_vm1, %v3405_v12  ;;  %v3387_v7 = vpop.eup %3386 }
 0x6b1   : > { %v3389_v9 = vpop.eup %3388 }
 0x6b2   : > { %v2422_v8 = vadd.f32 %v3387_v7, %v2421_v6  ;;  %v3391_v13 = vpop.eup %3390 }
 0x6b3   : > { %3163 = vmatmul.mubr.msk.f32.gmra.mrb[32].mxu0 %vm2428_vm2, %v3385_v5 }
 0x6b4   : > { %v2423_v10 = vadd.f32 %v3389_v9, %v2422_v8  ;;  %3165 = vmatprep.mubr.msk.f32.mxu0 %vm3404_vm1, %v3405_v12 }
 0x6b6   : > { %v2424_v14 = vadd.f32 %v3391_v13, %v2423_v10 }
 0x6b7   : > { %3166 = vmatmul.mubr.msk.f32.gmra.mrb[34].mxu0 %vm2428_vm2, %v3387_v7 }
 0x6b8   : > { %3392 = vrcp.f32 %v2424_v14  ;;  %3168 = vmatprep.mubr.msk.f32.mxu0 %vm3404_vm1, %v3405_v12 }
 0x6bb   : > { %3169 = vmatmul.mubr.msk.f32.gmra.mrb[36].mxu0 %vm2428_vm2, %v3389_v9 }
 0x6bc   : > { %3171 = vmatprep.mubr.msk.f32.mxu0 %vm3404_vm1, %v3405_v12 }
 0x6bf   : > { %3172 = vmatmul.mubr.msk.f32.gmra.mrb[38].mxu0 %vm2428_vm2, %v3391_v13 }
 0x6c2   : > { %v3393_v15 = vpop.eup %3392 }
 0x6c3   : > { %3177 = vmatmul.mubr.msk.f32.vlgmr.msra.gmra.mrb[32].mxu1 %vm2428_vm2, %v3393_v15 }
 0x6c4   : > { %3183 = vmatprep.mubr.msk.f32.mxu1 %vm3404_vm1, %v3405_v12  ;;  %3286 = vmatpush3.bf16.msra.mxu1 %v3285_v18  ;;  %vm2726_vm1 = vcmask 261120  }
 0x71a   : > { %v3146_v19 = vpop.f32.mrb[28].mxu1 }
 0x71b   : > { %v2301_v20 = vpop.f32.mrb[29].mxu1 }
 0x722   : > { %v3149_v21 = vpop.f32.mrb[30].mxu1 }
 0x723   : > { %v2311_v22 = vpop.f32.mrb[31].mxu1 }
 0x782   : > { %v2514_v35 = vpop.f32.mrb[30].mxu0 }
 0x783   : > { %v2538_v23 = vmul.f32 %v2514_v35, %v2398_v56  ;;  %v3161_v24 = vpop.f32.mrb[31].mxu0 }
 0x786   : > { %v2519_v26 = vpop.f32.mrb[32].mxu0 }
 0x787   : > { %v2539_v34 = vmul.f32 %v2519_v26, %v2301_v20  ;;  %v3164_v12 = vpop.f32.mrb[33].mxu0 }
 0x789   : > { %v2543_v45 = vadd.f32 %v2539_v34, %v2538_v23 }
 0x78a   : > { %v2524_v28 = vpop.f32.mrb[34].mxu0 }
 0x78b   : > { %v2540_v30 = vmul.f32 %v3146_v19, %v2524_v28  ;;  %v3167_v25 = vpop.f32.mrb[35].mxu0 }
 0x78d   : > { %v2544_v47 = vadd.f32 %v2543_v45, %v2540_v30 }
 0x78e   : > { %v2529_v32 = vpop.f32.mrb[36].mxu0 }
 0x78f   : > { %v2541_v36 = vmul.f32 %v2529_v32, %v2311_v22  ;;  %v3170_v39 = vpop.f32.mrb[37].mxu0 }
 0x791   : > { %v2545_v40 = vadd.f32 %v2544_v47, %v2541_v36 }
 0x792   : > { %v2534_v41 = vpop.f32.mrb[38].mxu0 }
 0x793   : > { %v2542_v42 = vmul.f32 %v3149_v21, %v2534_v41  ;;  %v3173_v43 = vpop.f32.mrb[39].mxu0 }
 0x795   : > { %v2546_v44 = vadd.f32 %v2545_v40, %v2542_v42 }
 0x796   : > { %v2616_v46 = vpop.f32.mrb[32].mxu1 }
 0x797   : > { %v2620_v48 = vmul.f32 %v2616_v46, %v2546_v44  ;;  %v3178_v49 = vpop.f32.mrb[33].mxu1 }
 0x799   : > { %3184 = vmatmul.mubr.msk.f32.vlgmr.msra.gmra.mrb[34].mxu1 %vm658_vm0, %v2620_v48 }
 0x86c   : > { %v2692_v50 = vpop.f32.mrb[34].mxu1 }
 0x86d   : > { %v3185_v51 = vpop.f32.mrb[35].mxu1  ;;  %v2701_v52 = vrot.slane %v2692_v50, 2  ;;  %v2697_v53 = vrot.slane %v2692_v50, 1  ;;  %v2709_v29 = vrot.slane %v2692_v50, 4  ;;  %v2705_v11 = vrot.slane %v2692_v50, 3 }
 0x86e   : > { %v2717_v54 = vrot.slane %v2692_v50, 6  ;;  %v2713_v55 = vrot.slane %v2692_v50, 5  ;;  %v2721_v27 = vrot.slane %v2692_v50, 7 }
 0x86f   : > { %2702 = vrot.lane.b32.xlu1 %v2701_v52, %s3410_s27  ;;  %2698 = vrot.lane.b32.xlu0 %v2697_v53, %s3411_s20 }
 0x873   : > { %2710 = vrot.lane.b32.xlu1 %v2709_v29, %s3412_s29  ;;  %2706 = vrot.lane.b32.xlu0 %v2705_v11, %s3413_s21 }
 0x877   : > { %2718 = vrot.lane.b32.xlu1 %v2717_v54, %s3407_s28  ;;  %2714 = vrot.lane.b32.xlu0 %v2713_v55, %s3414_s1 }
 0x87b   : > { %2722 = vrot.lane.b32.xlu0 %v2721_v27, %s3406_s2 }
 0x8e1   : > { %v2703_v37 = vpop.permute.xlu1 %2702  ;;  %v2699_v56 = vpop.permute.xlu0 %2698 }
 0x8e2   : > { %v2725_v59 = vsel %vm658_vm0, %v2692_v50, %v2699_v56 }
 0x8e3   : > { %v2727_v60 = vsel %vm2726_vm1, %v2725_v59, %v2703_v37 }
 0x8e5   : > { %v2711_v38 = vpop.permute.xlu1 %2710  ;;  %v2707_v57 = vpop.permute.xlu0 %2706 }
 0x8e6   : > { %v2729_v62 = vsel %vm2728_vm3, %v2727_v60, %v2707_v57 }
 0x8e7   : > { %v2731_v33 = vsel %vm2730_vm4, %v2729_v62, %v2711_v38 }
 0x8e9   : > { %v2715_v63 = vpop.permute.xlu0 %2714  ;;  %v2719_v0 = vpop.permute.xlu1 %2718 }
 0x8ea   : > { %v2733_v1 = vsel %vm2732_vm5, %v2731_v33, %v2715_v63 }
 0x8eb   : > { %v2735_v31 = vsel %vm2734_vm6, %v2733_v1, %v2719_v0 }
 0x8ed   : > { %v2723_v2 = vpop.permute.xlu0 %2722 }
 0x8ee   : > { %v2737_v58 = vsel %vm2736_vm7, %v2735_v31, %v2723_v2 }
 0x8ef   : > { %2738 = vst [vmem:[%s655_s22] sm:$0x1] %v2737_v58 }
 0x8f0 PF: > { %s29_s0 = sadd.s32 1, %s3400_s0  }
 0x8f1   : > { %p26_p4 = scmp.ge.s32.totalorder %s29_s0, 4  }
 0x8f3   :  { %28 = sbr.rel (!%p26_p4) target bundleno = 5 (0x5), region = 135 }

</bundles_post_ra>
